<compile_context>
chip_gen: v5e
topology: v5e:2x2
jax: 0.10.0
libtpu: 0.0.40
codegen_flags: <defaults>
</compile_context>

<pallas_src>
import functools

import jax
import jax.numpy as jnp
from jax import lax
from jax.experimental import pallas as pl
from jax.experimental.pallas import tpu as pltpu

N_ATTR = 37
STYLE_OUT = 256
STYLE_CH = STYLE_OUT + N_ATTR  # 293


def _round_up(x, m):
    return (x + m - 1) // m * m


# ----------------------------------------------------------------------------
# Kernel 1: tiled GEMM, bf16 operands on the MXU, f32 accumulator, fused
#           bias + activation epilogue. Every conv / conv-transpose routes here.
# ----------------------------------------------------------------------------
def _matmul_kernel(a_ref, b_ref, bias_ref, o_ref, acc_ref, *, activation):
    @pl.when(pl.program_id(2) == 0)
    def _():
        acc_ref[...] = jnp.zeros_like(acc_ref)

    acc_ref[...] += jnp.dot(a_ref[...], b_ref[...],
                            preferred_element_type=jnp.float32)

    @pl.when(pl.program_id(2) == pl.num_programs(2) - 1)
    def _():
        r = acc_ref[...] + bias_ref[...]
        if activation == "relu":
            r = jnp.maximum(r, 0.0)
        elif activation == "tanh":
            r = jnp.tanh(r)
        o_ref[...] = r


def _pick_tiles(M, K, N):
    mp8 = _round_up(M, 8)
    tm = min(512, mp8)
    tn = min(256, _round_up(N, 128))
    kp128 = _round_up(K, 128)
    if kp128 <= 2048:
        tk = kp128                      # single K step whenever it fits
    elif mp8 <= 128:
        tk = 2048                       # latency-bound small-M GEMMs: few big K steps
    else:
        tk = 512
    return tm, tn, tk


def pallas_matmul(a, b, bias=None, activation="none"):
    """(M, K) @ (K, N) + bias with fused activation. Inputs cast to bf16."""
    M, K = a.shape
    _, N = b.shape
    tm, tn, tk = _pick_tiles(M, K, N)
    Mp, Kp, Np = _round_up(M, tm), _round_up(K, tk), _round_up(N, tn)

    a_p = a if a.dtype == jnp.bfloat16 else a.astype(jnp.bfloat16)
    if (Mp, Kp) != (M, K):
        a_p = jnp.pad(a_p, ((0, Mp - M), (0, Kp - K)))
    b_p = b if b.dtype == jnp.bfloat16 else b.astype(jnp.bfloat16)
    if (Kp, Np) != (K, N):
        b_p = jnp.pad(b_p, ((0, Kp - K), (0, Np - N)))
    bias_p = jnp.zeros((1, Np), jnp.float32)
    if bias is not None:
        bias_p = bias_p.at[0, :N].set(bias.astype(jnp.float32))

    grid = (Mp // tm, Np // tn, Kp // tk)
    out = pl.pallas_call(
        functools.partial(_matmul_kernel, activation=activation),
        out_shape=jax.ShapeDtypeStruct((Mp, Np), jnp.float32),
        grid_spec=pltpu.PrefetchScalarGridSpec(
            num_scalar_prefetch=0,
            grid=grid,
            in_specs=[
                pl.BlockSpec((tm, tk), lambda i, j, k: (i, k)),
                pl.BlockSpec((tk, tn), lambda i, j, k: (k, j)),
                pl.BlockSpec((1, tn), lambda i, j, k: (0, j)),
            ],
            out_specs=pl.BlockSpec((tm, tn), lambda i, j, k: (i, j)),
            scratch_shapes=[pltpu.VMEM((tm, tn), jnp.float32)],
        ),
        compiler_params=pltpu.CompilerParams(
            dimension_semantics=("parallel", "parallel", "arbitrary")),
    )(a_p, b_p, bias_p)
    return out[:M, :N]


# ----------------------------------------------------------------------------
# Kernel 2: instance norm (per (b, c) over H*W), row-blocked, optional ReLU.
# ----------------------------------------------------------------------------
def _instnorm_kernel(x_ref, o_ref, *, hw, activation):
    x = x_ref[...]
    inv_hw = 1.0 / hw
    mean = jnp.sum(x, axis=1, keepdims=True) * inv_hw
    var = jnp.sum(x * x, axis=1, keepdims=True) * inv_hw - mean * mean
    var = jnp.maximum(var, 0.0)                 # guard single-pass variance
    y = (x - mean) * lax.rsqrt(var + 1e-5)
    if activation == "relu":
        y = jnp.maximum(y, 0.0)
    o_ref[...] = y


def instance_norm(x, activation="none"):
    B, C, H, W = x.shape
    hw = H * W
    rows = B * C
    block_rows = min(256, _round_up(rows, 8))
    rp = _round_up(rows, block_rows)
    xm = x.reshape(rows, hw).astype(jnp.float32)
    if rp != rows:
        xm = jnp.pad(xm, ((0, rp - rows), (0, 0)))
    out = pl.pallas_call(
        functools.partial(_instnorm_kernel, hw=hw, activation=activation),
        out_shape=jax.ShapeDtypeStruct((rp, hw), jnp.float32),
        grid_spec=pltpu.PrefetchScalarGridSpec(
            num_scalar_prefetch=0,
            grid=(rp // block_rows,),
            in_specs=[pl.BlockSpec((block_rows, hw), lambda i: (i, 0))],
            out_specs=pl.BlockSpec((block_rows, hw), lambda i: (i, 0)),
        ),
        compiler_params=pltpu.CompilerParams(
            dimension_semantics=("parallel",)),
    )(xm)
    return out[:rows].reshape(B, C, H, W)


# ----------------------------------------------------------------------------
# Kernel 3: self-attention core, per batch, lane-dense (C, HW) layout.
#   energy[i,j] = sum_c q[c,i] k[c,j]   (dot_general contracting over Cq)
#   out[c,i]    = sum_j v[c,j] attn[i,j] (dot_general, NT form)
#   y = gamma * out + x                  (+ optional fused ReLU)
# ----------------------------------------------------------------------------
def _sa_kernel(gamma_ref, q_ref, k_ref, v_ref, x_ref, o_ref, *, apply_relu):
    q = q_ref[0]                                  # (Cq, HW) bf16
    k = k_ref[0]                                  # (Cq, HW) bf16
    energy = lax.dot_general(q, k, (((0,), (0,)), ((), ())),
                             preferred_element_type=jnp.float32)   # (HW, HW)
    energy = energy - jnp.max(energy, axis=-1, keepdims=True)
    p = jnp.exp(energy)
    attn = p * pl.reciprocal(jnp.sum(p, axis=-1, keepdims=True), approx=True)
    attn = attn.astype(q.dtype)                   # bf16 probs, f32 softmax math
    out = lax.dot_general(v_ref[0], attn, (((1,), (1,)), ((), ())),
                          preferred_element_type=jnp.float32)      # (C, HW)
    y = gamma_ref[...] * out + x_ref[0]
    if apply_relu:
        y = jnp.maximum(y, 0.0)
    o_ref[0] = y


def self_attention(x, p, apply_relu=False):
    B, C, H, W = x.shape
    HW = H * W
    q = conv2d(x, p["wq"], p["bq"])               # 1x1 convs -> GEMM kernel
    k = conv2d(x, p["wk"], p["bk"])
    v = conv2d(x, p["wv"], p["bv"])
    cq = q.shape[1]
    q_m = q.reshape(B, cq, HW).astype(jnp.bfloat16)   # lane-dense, no transpose
    k_m = k.reshape(B, cq, HW).astype(jnp.bfloat16)
    v_m = v.reshape(B, C, HW).astype(jnp.bfloat16)
    x_m = x.reshape(B, C, HW).astype(jnp.float32)
    out = pl.pallas_call(
        functools.partial(_sa_kernel, apply_relu=apply_relu),
        out_shape=jax.ShapeDtypeStruct((B, C, HW), jnp.float32),
        grid_spec=pltpu.PrefetchScalarGridSpec(
            num_scalar_prefetch=0,
            grid=(B,),
            in_specs=[
                pl.BlockSpec((1, 1), lambda b: (0, 0)),
                pl.BlockSpec((1, cq, HW), lambda b: (b, 0, 0)),
                pl.BlockSpec((1, cq, HW), lambda b: (b, 0, 0)),
                pl.BlockSpec((1, C, HW), lambda b: (b, 0, 0)),
                pl.BlockSpec((1, C, HW), lambda b: (b, 0, 0)),
            ],
            out_specs=pl.BlockSpec((1, C, HW), lambda b: (b, 0, 0)),
        ),
        compiler_params=pltpu.CompilerParams(
            dimension_semantics=("parallel",),          # B shards across v7x TCs
            vmem_limit_bytes=40 * 1024 * 1024),         # < 64 MiB (v7x physical)
    )(p["gamma"], q_m, k_m, v_m, x_m)
    return out.reshape(B, C, H, W)


# ----------------------------------------------------------------------------
# Kernel 4: channel attention, per batch, lane-dense (C, HW) layout.
# Global-avg-pool is folded into the first 1x1 conv by linearity:
#   W1 @ mean_hw(x) == mean_hw(W1 @ x)
# ----------------------------------------------------------------------------
def _ca_kernel(x_ref, w1_ref, b1_ref, w2_ref, b2_ref, o_ref, *, hw, apply_relu):
    x = x_ref[0]                                             # (C, HW) f32
    inv_hw = 1.0 / hw
    h_full = jnp.dot(w1_ref[...], x,
                     preferred_element_type=jnp.float32)     # (Cr, HW)
    h = jnp.maximum(jnp.sum(h_full, axis=1, keepdims=True) * inv_hw
                    + b1_ref[...], 0.0)                      # (Cr, 1)
    h_b = jnp.broadcast_to(h, (h.shape[0], x.shape[1]))      # (Cr, HW)
    g = jax.nn.sigmoid(jnp.dot(w2_ref[...], h_b,
                               preferred_element_type=jnp.float32)
                       + b2_ref[...])                        # (C, HW)
    y = x * g
    if apply_relu:
        y = jnp.maximum(y, 0.0)
    o_ref[0] = y


def channel_attn(x, p, apply_relu=False):
    B, C, H, W = x.shape
    HW = H * W
    cr = p["w1"].shape[0]
    x_m = x.reshape(B, C, HW).astype(jnp.float32)   # lane-dense, no transpose
    w1 = p["w1"].reshape(cr, C)
    b1 = p["b1"].reshape(cr, 1)
    w2 = p["w2"].reshape(C, cr)
    b2 = p["b2"].reshape(C, 1)
    out = pl.pallas_call(
        functools.partial(_ca_kernel, hw=HW, apply_relu=apply_relu),
        out_shape=jax.ShapeDtypeStruct((B, C, HW), jnp.float32),
        grid_spec=pltpu.PrefetchScalarGridSpec(
            num_scalar_prefetch=0,
            grid=(B,),
            in_specs=[
                pl.BlockSpec((1, C, HW), lambda b: (b, 0, 0)),
                pl.BlockSpec((cr, C), lambda b: (0, 0)),
                pl.BlockSpec((cr, 1), lambda b: (0, 0)),
                pl.BlockSpec((C, cr), lambda b: (0, 0)),
                pl.BlockSpec((C, 1), lambda b: (0, 0)),
            ],
            out_specs=pl.BlockSpec((1, C, HW), lambda b: (b, 0, 0)),
        ),
        compiler_params=pltpu.CompilerParams(
            dimension_semantics=("parallel",)),
    )(x_m, w1, b1, w2, b2)
    return out.reshape(B, C, H, W)


# ----------------------------------------------------------------------------
# Conv / ConvTranspose wrappers (im2col glue around the GEMM kernel).
# Patches are materialized directly in bf16 to halve the slab HBM traffic.
# TODO(synk): im2col could be fused into the GEMM K-loop via index_map DMA.
# ----------------------------------------------------------------------------
def _im2col(x, KH, KW, stride, padding):
    B, Cin, H, W = x.shape
    xp = x.astype(jnp.bfloat16)
    if padding:
        xp = jnp.pad(xp, ((0, 0), (0, 0), (padding, padding), (padding, padding)))
    OH = (H + 2 * padding - KH) // stride + 1
    OW = (W + 2 * padding - KW) // stride + 1
    cols = [xp[:, :, kh:kh + stride * OH:stride, kw:kw + stride * OW:stride]
            for kh in range(KH) for kw in range(KW)]
    patches = jnp.stack(cols, axis=2)                       # (B, Cin, KH*KW, OH, OW)
    patches = patches.transpose(0, 3, 4, 1, 2).reshape(B * OH * OW, Cin * KH * KW)
    return patches, OH, OW


def conv2d(x, w, bias=None, stride=1, padding=0, activation="none"):
    B, Cin, H, W = x.shape
    Cout, _, KH, KW = w.shape
    if KH == 1 and KW == 1 and stride == 1 and padding == 0:
        patches = x.astype(jnp.bfloat16).transpose(0, 2, 3, 1).reshape(B * H * W, Cin)
        OH, OW = H, W
    else:
        patches, OH, OW = _im2col(x, KH, KW, stride, padding)
    wmat = w.reshape(Cout, Cin * KH * KW).T.astype(jnp.bfloat16)
    out = pallas_matmul(patches, wmat, bias, activation)    # (B*OH*OW, Cout)
    return out.reshape(B, OH, OW, Cout).transpose(0, 3, 1, 2)


def conv_transpose2d(x, w):
    # Only the (kernel=4, stride=2, padding=1, bias=False) case used by the model.
    # Decomposed into 4 interleaved 2x2 sub-convolutions (one per output-pixel
    # parity) fused into a single GEMM -> no zero-dilated input is materialized.
    B, Cin, H, W = x.shape
    _, Cout, KH, KW = w.shape
    wflip = jnp.flip(w, axis=(2, 3)).transpose(1, 0, 2, 3)       # (Cout, Cin, 4, 4)
    wbig = jnp.zeros((Cin, 3, 3, 4, Cout), jnp.float32)
    for r in (0, 1):
        for s in (0, 1):
            sub = wflip[:, :, r::2, s::2].transpose(1, 2, 3, 0)  # (Cin, 2, 2, Cout)
            wbig = wbig.at[:, r:r + 2, s:s + 2, 2 * r + s, :].set(sub)
    wmat = wbig.reshape(Cin * 9, 4 * Cout).astype(jnp.bfloat16)
    patches, OH, OW = _im2col(x, 3, 3, 1, 1)                     # OH=H, OW=W
    out = pallas_matmul(patches, wmat)                           # (B*H*W, 4*Cout)
    out = out.reshape(B, H, W, 2, 2, Cout)
    out = out.transpose(0, 5, 1, 3, 2, 4).reshape(B, Cout, 2 * H, 2 * W)
    return out


# ----------------------------------------------------------------------------
# Parameter construction (deterministic, synthetic).
# ----------------------------------------------------------------------------
class PInit:
    def __init__(self, seed=0, scale=0.05):
        self.key = jax.random.PRNGKey(seed)
        self.scale = scale

    def take(self, shape):
        self.key, sub = jax.random.split(self.key)
        return (self.scale * jax.random.normal(sub, shape)).astype(jnp.float32)


def make_conv(pi, cout, cin, k, bias):
    return {"w": pi.take((cout, cin, k, k)),
            "b": pi.take((cout,)) if bias else None}


def make_ca(pi, c, ratio=4):
    cr = c // ratio
    return {"w1": pi.take((cr, c, 1, 1)), "b1": pi.take((cr,)),
            "w2": pi.take((c, cr, 1, 1)), "b2": pi.take((c,))}


def make_sa(pi, c):
    cq = c // 8
    return {"wq": pi.take((cq, c, 1, 1)), "bq": pi.take((cq,)),
            "wk": pi.take((cq, c, 1, 1)), "bk": pi.take((cq,)),
            "wv": pi.take((c, c, 1, 1)), "bv": pi.take((c,)),
            "gamma": jnp.zeros((1, 1), jnp.float32)}  # torch.zeros(1)


def make_up(pi, cin, cout, n_attr, ratio, attention):
    p = {"convT_w": pi.take((cin, cout, 4, 4)), "attention": attention}
    if attention:
        p["img_sa"] = make_sa(pi, cout)
    stages = []
    for _ in range(ratio):
        st = {"conv": make_conv(pi, n_attr, n_attr, 4, bias=True),
              "ca": make_ca(pi, n_attr)}
        if attention:
            st["sa"] = make_sa(pi, n_attr)
        stages.append(st)
    p["attr"] = stages
    p["ia_conv"] = make_conv(pi, cout, n_attr + cout, 3, bias=False)
    p["ia_ca1"] = make_ca(pi, cout)
    p["ia_ca2"] = make_ca(pi, cout)
    return p


def build_params(seed=0, in_channels=3, out_channels=3):
    pi = PInit(seed)
    P = {}
    # ---- StyleEncoder ----
    se = {"conv0": pi.take((64, 3 * 4, 7, 7))}
    se_chans = [(64, 128, True), (128, 256, True), (256, 512, True),
                (512, 512, True), (512, 512, True), (512, STYLE_OUT, False)]
    se["downs"] = [{"w": pi.take((co, ci, 4, 4)), "normalize": nm}
                   for ci, co, nm in se_chans]
    se["res"] = [{"w1": pi.take((STYLE_CH, STYLE_CH, 3, 3)),
                  "w2": pi.take((STYLE_CH, STYLE_CH, 3, 3))} for _ in range(8)]
    P["se"] = se
    # ---- Generator trunk ----
    P["conv_w"] = pi.take((64, in_channels, 7, 7))
    gen_chans = [(64, 64, True), (64, 128, True), (128, 256, True),
                 (256, 512, True), (512, 512, True), (512, 512, False)]
    P["down"] = [{"w": pi.take((co, ci, 4, 4)), "normalize": nm}
                 for ci, co, nm in gen_chans]
    P["fc_w"] = pi.take((52, 512, 1, 1))
    P["skip"] = [pi.take((512, 512 + STYLE_CH, 3, 3)),
                 pi.take((512, 512 + STYLE_CH, 3, 3)),
                 pi.take((256, 256 + STYLE_CH, 3, 3)),
                 pi.take((128, 128 + STYLE_CH, 3, 3)),
                 pi.take((64, 64 + STYLE_CH, 3, 3))]
    P["up1"] = make_up(pi, 512 + STYLE_CH, 512, N_ATTR, 5, False)
    P["up2"] = make_up(pi, 1024, 512, N_ATTR, 4, True)
    P["up3"] = make_up(pi, 1024, 256, N_ATTR, 3, True)
    P["up4"] = make_up(pi, 512, 128, N_ATTR, 2, True)
    P["up5"] = make_up(pi, 256, 64, N_ATTR, 1, False)
    P["out_w"] = pi.take((out_channels, 128, 4, 4))
    P["out_b"] = pi.take((out_channels,))
    return P


# ----------------------------------------------------------------------------
# Module forward passes (composition glue around the Pallas kernels).
# ----------------------------------------------------------------------------
def style_encoder_forward(p, x, attr_diff):
    x = instance_norm(conv2d(x, p["conv0"], None, 1, 3), "relu")
    for dp in p["downs"]:
        x = conv2d(x, dp["w"], None, 2, 1)
        if dp["normalize"]:
            x = instance_norm(x)
    # x: (B, 256, 1, 1)
    x = x[:, :, 0, :]                                       # squeeze(2) -> (B, 256, 1)
    attr = attr_diff[:, :, None].astype(jnp.float32)        # (B, 37, 1)
    s = jnp.concatenate([x, attr], axis=1)[:, :, None, :]   # (B, 293, 1, 1)
    for rb in p["res"]:
        y = instance_norm(conv2d(s, rb["w1"], None, 1, 1), "relu")
        y = instance_norm(conv2d(y, rb["w2"], None, 1, 1))
        s = s + y
    return s


def up_forward(x, attr_vec, h, p):
    # image path: ConvTranspose2d -> [SelfAttention] -> InstanceNorm -> ReLU
    x = conv_transpose2d(x, p["convT_w"])
    if p["attention"]:
        x = self_attention(x, p["img_sa"], apply_relu=False)
    x = instance_norm(x, "relu")
    # TODO(synk): Dropout layers are identity (inference-mode semantics).

    # attr path: rank-1 outer product attr_vec @ attr_vec^T (broadcast multiply glue)
    attr = (attr_vec[:, :, :, None] * attr_vec[:, :, None, :]).astype(jnp.float32)
    for st in p["attr"]:
        attr = conv2d(attr, st["conv"]["w"], st["conv"]["b"], stride=2, padding=1)
        if p["attention"]:
            attr = channel_attn(attr, st["ca"], apply_relu=False)
            attr = self_attention(attr, st["sa"], apply_relu=True)
        else:
            attr = channel_attn(attr, st["ca"], apply_relu=True)

    img_attr = jnp.concatenate([x, attr], axis=1)
    y = instance_norm(conv2d(img_attr, p["ia_conv"]["w"], None, 1, 1), "relu")
    y = channel_attn(y, p["ia_ca1"], apply_relu=False)
    y = channel_attn(y, p["ia_ca2"], apply_relu=True)
    return jnp.concatenate([y, h], axis=1)


def generator_forward(P, src_image, src_style, attr_difference, attr_feature):
    s_hat = style_encoder_forward(P["se"], src_style, attr_difference)  # (B,293,1,1)

    x = instance_norm(conv2d(src_image, P["conv_w"], None, 1, 3), "relu")
    cs = []
    for dp in P["down"]:
        x = conv2d(x, dp["w"], None, 2, 1)
        if dp["normalize"]:
            x = instance_norm(x)
        cs.append(x)
    c1, c2, c3, c4, c5, c6 = cs

    logits = jnp.squeeze(conv2d(c6, P["fc_w"], None, 1, 0))   # (B, 52)
    h = jnp.concatenate([c6, s_hat], axis=1)

    def skip(c, w):
        s_tile = jnp.tile(s_hat, (1, 1, c.shape[2], c.shape[3]))
        return instance_norm(
            conv2d(jnp.concatenate([c, s_tile], axis=1), w, None, 1, 1), "relu")

    h1 = skip(c5, P["skip"][0]); g1 = up_forward(h, attr_feature, h1, P["up1"])
    h2 = skip(c4, P["skip"][1]); g2 = up_forward(g1, attr_feature, h2, P["up2"])
    h3 = skip(c3, P["skip"][2]); g3 = up_forward(g2, attr_feature, h3, P["up3"])
    h4 = skip(c2, P["skip"][3]); g4 = up_forward(g3, attr_feature, h4, P["up4"])
    h5 = skip(c1, P["skip"][4]); g5 = up_forward(g4, attr_feature, h5, P["up5"])

    # out_conv: Upsample(x2, nearest) -> ZeroPad2d((1,0,1,0)) -> Conv2d(128,3,4,p=1) -> Tanh
    g5u = jnp.repeat(jnp.repeat(g5, 2, axis=2), 2, axis=3)
    g5p = jnp.pad(g5u, ((0, 0), (0, 0), (1, 0), (1, 0)))
    out = conv2d(g5p, P["out_w"], P["out_b"], stride=1, padding=1, activation="tanh")
    return out, logits


# ----------------------------------------------------------------------------
if __name__ == "__main__":
    key = jax.random.PRNGKey(0)
    k1, k2, k3, k4 = jax.random.split(key, 4)
    B = 2
    src_image = jax.random.normal(k1, (B, 3, 64, 64), jnp.float32)
    src_style = jax.random.normal(k2, (B, 3 * 4, 64, 64), jnp.float32)
    attr_difference = jax.random.normal(k3, (B, N_ATTR), jnp.float32)
    attr_feature = jax.random.normal(k4, (B, N_ATTR, 64), jnp.float32)

    params = build_params(seed=0, in_channels=3, out_channels=3)

    out, logits = generator_forward(params, src_image, src_style,
                                    attr_difference, attr_feature)
    out, logits = jax.block_until_ready((out, logits))

    assert out.shape == (B, 3, 64, 64), out.shape
    assert logits.shape == (B, 52), logits.shape
    assert bool(jnp.all(jnp.isfinite(out))) and bool(jnp.all(jnp.isfinite(logits)))
    print("KERNEL_OK")
</pallas_src>

<mosaic_0001>
module attributes {stable_mosaic.version = 11 : i64} {
  func.func @_matmul_kernel(%arg0: i32, %arg1: i32, %arg2: i32, %arg3: memref<512x640xbf16, #tpu.memory_space<vmem>>, %arg4: memref<640x128xbf16, #tpu.memory_space<vmem>>, %arg5: memref<1x128xf32, #tpu.memory_space<vmem>>, %arg6: memref<512x128xf32, #tpu.memory_space<vmem>>, %arg7: memref<512x128xf32, #tpu.memory_space<vmem>>) attributes {dimension_semantics = [#tpu.dimension_semantics<parallel>, #tpu.dimension_semantics<parallel>, #tpu.dimension_semantics<arbitrary>], iteration_bounds = array<i64: 16, 1, 1>, scalar_prefetch = 0 : i64, scratch_operands = 1 : i64, tpu.core_type = #tpu.core_type<tc>, window_params = [{transform_indices = @transform_0, window_bounds = array<i64: 512, 640>}, {transform_indices = @transform_1, window_bounds = array<i64: 640, 128>}, {transform_indices = @transform_2, window_bounds = array<i64: 1, 128>}, {transform_indices = @transform_3, window_bounds = array<i64: 512, 128>}]} {
    %c0_i32 = arith.constant 0 : i32
    %0 = arith.cmpi eq, %arg2, %c0_i32 : i32
    %1 = arith.extui %0 : i1 to i32
    %c0_i32_0 = arith.constant 0 : i32
    %2 = arith.cmpi ne, %1, %c0_i32_0 : i32
    scf.if %2 {
      %cst_10 = arith.constant 0.000000e+00 : f32
      %12 = vector.broadcast %cst_10 : f32 to vector<512x128xf32>
      %c0_11 = arith.constant 0 : index
      %c0_12 = arith.constant 0 : index
      %13 = vector.load %arg7[%c0_11, %c0_12] : memref<512x128xf32, #tpu.memory_space<vmem>>, vector<512x128xf32>
      tpu.vector_store %arg7[%c0_11, %c0_12], %12 {strides = array<i32>} : memref<512x128xf32, #tpu.memory_space<vmem>>, vector<512x128xf32>,
    } else {
    }
    %c0 = arith.constant 0 : index
    %c0_1 = arith.constant 0 : index
    %3 = vector.load %arg7[%c0, %c0_1] : memref<512x128xf32, #tpu.memory_space<vmem>>, vector<512x128xf32>
    %c0_2 = arith.constant 0 : index
    %c0_3 = arith.constant 0 : index
    %4 = vector.load %arg3[%c0_2, %c0_3] : memref<512x640xbf16, #tpu.memory_space<vmem>>, vector<512x640xbf16>
    %c0_4 = arith.constant 0 : index
    %c0_5 = arith.constant 0 : index
    %5 = vector.load %arg4[%c0_4, %c0_5] : memref<640x128xbf16, #tpu.memory_space<vmem>>, vector<640x128xbf16>
    %cst = arith.constant dense<0.000000e+00> : vector<512x128xf32>
    %6 = tpu.matmul %4, %5, %cst {dimension_numbers = #tpu.dot_dimension_numbers<[1], [0], [0], [1], [0, 0, 1, 1], [], []>} : vector<512x640xbf16>, vector<640x128xbf16>, vector<512x128xf32> -> vector<512x128xf32>
    %7 = arith.addf %3, %6 : vector<512x128xf32>
    %c0_6 = arith.constant 0 : index
    %c0_7 = arith.constant 0 : index
    %8 = vector.load %arg7[%c0_6, %c0_7] : memref<512x128xf32, #tpu.memory_space<vmem>>, vector<512x128xf32>
    tpu.vector_store %arg7[%c0_6, %c0_7], %7 {strides = array<i32>} : memref<512x128xf32, #tpu.memory_space<vmem>>, vector<512x128xf32>,
    %c0_i32_8 = arith.constant 0 : i32
    %9 = arith.cmpi eq, %arg2, %c0_i32_8 : i32
    %10 = arith.extui %9 : i1 to i32
    %c0_i32_9 = arith.constant 0 : i32
    %11 = arith.cmpi ne, %10, %c0_i32_9 : i32
    scf.if %11 {
      %c0_10 = arith.constant 0 : index
      %c0_11 = arith.constant 0 : index
      %12 = vector.load %arg7[%c0_10, %c0_11] : memref<512x128xf32, #tpu.memory_space<vmem>>, vector<512x128xf32>
      %c0_12 = arith.constant 0 : index
      %c0_13 = arith.constant 0 : index
      %13 = vector.load %arg5[%c0_12, %c0_13] : memref<1x128xf32, #tpu.memory_space<vmem>>, vector<1x128xf32>
      %14 = vector.broadcast %13 : vector<1x128xf32> to vector<512x128xf32>
      %15 = arith.addf %12, %14 : vector<512x128xf32>
      %c0_14 = arith.constant 0 : index
      %c0_15 = arith.constant 0 : index
      %16 = vector.load %arg6[%c0_14, %c0_15] : memref<512x128xf32, #tpu.memory_space<vmem>>, vector<512x128xf32>
      tpu.vector_store %arg6[%c0_14, %c0_15], %15 {strides = array<i32>} : memref<512x128xf32, #tpu.memory_space<vmem>>, vector<512x128xf32>,
    } else {
    }
    return
  }
  func.func @transform_0(%arg0: i32, %arg1: i32, %arg2: i32) -> (i32, i32) {
    %c0_i32 = arith.constant 0 : i32
    return %arg0, %arg2 : i32, i32
  }
  func.func @transform_1(%arg0: i32, %arg1: i32, %arg2: i32) -> (i32, i32) {
    %c0_i32 = arith.constant 0 : i32
    return %arg2, %arg1 : i32, i32
  }
  func.func @transform_2(%arg0: i32, %arg1: i32, %arg2: i32) -> (i32, i32) {
    %c0_i32 = arith.constant 0 : i32
    %c0_i32_0 = arith.constant 0 : i32
    return %c0_i32, %arg1 : i32, i32
  }
  func.func @transform_3(%arg0: i32, %arg1: i32, %arg2: i32) -> (i32, i32) {
    %c0_i32 = arith.constant 0 : i32
    return %arg0, %arg1 : i32, i32
  }
}

</mosaic_0001>

<bundles_post_ra>
// kernel: tpu_custom_call.1
= control target key start
LH: loop header
LB: loop body
LE: loop exit
PB: predicated region body
PF: predicated region fallthrough
CT: control target
= control target key end

     0   :  { %8 = vsyncpa [#allocation4], 0  ;;  %s5184_s0 = inlined_call_operand.hbm [shape: bf16[8192,640], index: 0, kind: input, shape index: {}]   ;;  %s5185_s1 = inlined_call_operand.hbm [shape: bf16[640,128], index: 1, kind: input, shape index: {}]   ;;  %s5186_s2 = inlined_call_operand.hbm [shape: f32[1,128], index: 2, kind: input, shape index: {}]   ;;  %s5187_s3 = inlined_call_operand.hbm [shape: f32[8192,128], index: 3, kind: output, shape index: {}]  }
   0x1   :  { %10 = vsyncpa [#allocation4 + $0x1], 0 }
   0x2   :  { %11 = vsyncpa [#allocation7], 0 }
   0x3   :  { %12 = vsyncpa [#allocation5], 0 }
   0x4   :  { %14 = vsyncpa [#allocation5 + $0x1], 0  ;;  %s4390_s12 = smov 0   ;;  %s4392_s13 = smov 0  }
   0x5   :  { %s4394_s14 = smov 0   ;;  %s4396_s15 = smov 0  }
   0x6   :  { %s4398_s16 = smov 0   ;;  %s4400_s17 = smov 0  }
   0x7 LB: > { %s3047_s18 = sadd.s32 4294967295, %s4360_s17   ;;  %s3048_s19 = sadd.s32 4294967294, %s4360_s17   ;;  %s4360_s17 = sphi %s4400_s17, %s20_s17   ;;  %s4356_s16 = sphi %s4398_s16, %s5242_s16   ;;  %s4352_s15 = sphi %s4396_s15, %s5241_s15   ;;  %s4348_s14 = sphi %s4394_s14, %s5240_s14   ;;  %s4344_s13 = sphi %s4392_s13, %s5239_s13   ;;  %s4340_s12 = sphi %s4390_s12, %s5238_s12  }
   0x8   : > { %p61_p0 = scmp.ne.s32.totalorder %s4344_s13, %s4340_s12  ;;  %p4424_p1 = scmp.eq.s32.totalorder %s3047_s18, 0 }
   0x9   : > { %p4428_p2 = scmp.eq.s32.totalorder %s3047_s18, 15  ;;  %p147_p3 = scmp.eq.s32.totalorder %s3048_s19, 15 }
   0xa   : > { %p4434_p4 = por %p4424_p1, %p61_p0  ;;  %p3049_p5 = scmp.ge.s32.totalorder %s4360_s17, 1 }
   0xb   : > { %p4439_p6 = por %p147_p3, %p61_p0  ;;  %p154_p7 = scmp.lt.s32.totalorder %s4360_s17, 17 }
   0xc   : > { %s169_s26 = sshll.u32 %s5185_s1, 4  ;;  %s4362_s28 = smov [#allocation6]   ;;  %s170_s26 = int_to_ptr.hbm [resolvable:$true] %s169_s26 }
   0xd   : > { %p4447_p8 = pnand %p3049_p5, %p154_p7  ;;  %s171_s29 = sshll.u32 %s4362_s28, 4  ;;  %s172_s29 = int_to_ptr.vmem [resolvable:$true] %s171_s29 }
   0xe   : > { %s185_s5 = sshll.u32 %s5186_s2, 4  ;;  %s4363_s6 = smov 64   ;;  %s186_s5 = int_to_ptr.hbm [resolvable:$true] %s185_s5 }
   0xf   : > { %p4105_p9 = pneg %p4447_p8  ;;  %s4364_s7 = smov 4  }
  0x10   : > { %s4365_s8 = smov [#allocation8]   ;;  %s39_s10 = sadd.s32 1, %s4356_s16 }
  0x11   : > { %p4106_p10 = pnand %p4105_p9, %p4424_p1  ;;  %s187_s9 = sshll.u32 %s4365_s8, 4  ;;  %s188_s9 = int_to_ptr.vmem [resolvable:$true] %s187_s9 }
  0x12   : > { %s48_s11 = sadd.s32 1, %s4348_s14  ;;  %p41_p11 = scmp.ge.s32.totalorder %s39_s10, 16 }
  0x13   : > { %4108 = dma.hbm_to_vmem [thread:$0]  (!%p4106_p10), %s170_s26, 5120, %s172_s29, [#allocation7], %s4363_s6, %s4363_s6, %s4364_s7  }
  0x14   : > { %4111 = dma.hbm_to_vmem [thread:$0]  (!%p4106_p10), %s186_s5, 16, %s188_s9, [#allocation7]  }
  0x15   : > { %p55_p12 = scmp.ne.s32.totalorder %s4348_s14, %s4344_s13  ;;  %p56_p13 = scmp.eq.s32.totalorder %s4360_s17, 0 }
  0x16   : > { %p4122_p0 = scmp.lt.s32.totalorder %s4360_s17, 16  ;;  %s5244_s10 = smov (%p41_p11, %s39_s10), 0 }
  0x17   : > { %p57_p3 = por %p56_p13, %p55_p12  ;;  %p4468_p5 = por %p4428_p2, %p55_p12 }
  0x18   : > { %s43_s19 = ssub.s32 %s4356_s16, %s5244_s10  ;;  %s198_s24 = sand.u32 1, %s4348_s14  }
  0x19   : > { %p46_p7 = scmp.eq.s32.totalorder %s43_s19, 0  ;;  %s4090_s25 = smul.u32 1280, %s198_s24 }
  0x1a   : > { %p4113_p9 = pnand %p4122_p0, %p57_p3  ;;  %s4091_s28 = smul.u32 1280, %s4356_s16 }
  0x1b   : > { %s4476_s26 = scalar_select %p46_p7, %s4348_s14, %s48_s11  }
  0x1c   : > { %s202_s29 = scalar_lea.vmem [#allocation3], %s4090_s25  ;;  %s210_s6 = scalar_lea.hbm %s5184_s0, %s4091_s28 }
  0x1d   : > { %s213_s30 = sshll.u32 %s202_s29, 4  ;;  %s211_s21 = sshll.u32 %s210_s6, 4  ;;  %s214_s30 = int_to_ptr.vmem [resolvable:$true] %s213_s30  ;;  %s212_s21 = int_to_ptr.hbm [resolvable:$true] %s211_s21 }
  0x1e   : > { %s199_s7 = scalar_lea.sflag [#allocation4], %s198_s24  ;;  %s4366_s8 = smov 320  }
  0x1f   : > { %s4367_s9 = smov 20   ;;  %225 = sbr.rel (%p4447_p8) target bundleno = 851 (0x353), region = 32 }
  0x20   : > { %4115 = dma.hbm_to_vmem [thread:$0]  (!%p4113_p9), %s212_s21, 20480, %s214_s30, %s199_s7, %s4366_s8, %s4366_s8, %s4367_s9  }
  0x24   : > { %s4485_s11 = sand.u32 1, %s4344_s13  }
  0x25   : > { %s4092_s19 = smul.u32 1280, %s4485_s11  ;;  %s228_s25 = scalar_lea.sflag [#allocation4], %s4485_s11 }
  0x27   : > { %s4489_s29 = scalar_lea.vmem [#allocation3], %s4092_s19 }
  0x28   : > { %4327 = dma.done.wait (%p4434_p4), %s228_s25, 20480  }
  0x29   : > { %4329 = vsyncadd (%p4434_p4), %s228_s25, 4294946816 }
  0x2a   : > { %4331 = dma.done.wait (%p4424_p1), [#allocation7], 5136  }
  0x2b   : > { %4333 = vsyncadd (%p4424_p1), [#allocation7], 4294962160  ;;  %v4032_v0 = vld [vmem:[#allocation6 + $0x38] sm:$0xff]  ;;  %v4031_v1 = vld [vmem:[#allocation6 + $0x30] sm:$0xff]  ;;  %s3059_s20 = sshll.u32 %s4485_s11, 9  ;;  %s4065_s27 = sshll.u32 %s4352_s15, 9 }
  0x2c   : > { %4066 = vmatpush.bf16.msra.mxu1 %v4032_v0  ;;  %4067 = vmatpush.bf16.msra.mxu2 %v4032_v0  ;;  %v4030_v2 = vld [vmem:[#allocation6 + $0x28] sm:$0xff]  ;;  %v4029_v3 = vld [vmem:[#allocation6 + $0x20] sm:$0xff]  ;;  %v4028_v4 = vld [vmem:[#allocation6 + $0x18] sm:$0xff]  ;;  %s4777_s22 = scalar_lea.vmem [#allocation9], %s3059_s20  ;;  %s2930_s30 = scalar_lea.hbm %s5187_s3, %s4065_s27 }
  0x2d   : > { %4068 = vmatpush.bf16.msra.mxu3 %v4032_v0  ;;  %1745 = vmatpush.bf16.msra.mxu0 %v4032_v0  ;;  %v4027_v5 = vld [vmem:[#allocation6 + $0x10] sm:$0xff]  ;;  %v4026_v6 = vld [vmem:[#allocation6 + $0x8] sm:$0xff]  ;;  %v4025_v7 = vld [vmem:[#allocation6] sm:$0xff]  ;;  %s2931_s4 = sshll.u32 %s4777_s22, 4  ;;  %s2933_s5 = sshll.u32 %s2930_s30, 4  ;;  %s2932_s4 = int_to_ptr.vmem [resolvable:$true] %s2931_s4  ;;  %s2934_s5 = int_to_ptr.hbm [resolvable:$true] %s2933_s5 }
  0x2e   : > { %v3222_v8 = vld [vmem:[%s4489_s29 + $0x140] sm:$0xf]  ;;  %v3907_v9 = vld [vmem:[%s4489_s29 + $0x150] sm:$0xf0]  ;;  %v4048_v16 = vld [vmem:[#allocation6 + $0xb8] sm:$0xff]  ;;  %s2918_s15 = scalar_lea.sflag [#allocation5], %s4485_s11 }
  0x2f   : > { %v3382_v10 = vld [vmem:[%s4489_s29 + $0x280] sm:$0xf]  ;;  %v3947_v11 = vld [vmem:[%s4489_s29 + $0x290] sm:$0xf0]  ;;  %v4056_v17 = vld [vmem:[#allocation6 + $0xf8] sm:$0xff]  ;;  %v3223_v18 = vor.u32 %v3907_v9, %v3222_v8  ;;  %s4288_s6 = sshra.s32 %s2934_s5, 4  ;;  %s4289_s6 = int_to_ptr.hbm [resolvable:$true] %s4288_s6 }
  0x30   : > { %4069 = vmatpush.bf16.msra.mxu1 %v4031_v1  ;;  %4070 = vmatpush.bf16.msra.mxu2 %v4031_v1  ;;  %v3542_v12 = vld [vmem:[%s4489_s29 + $0x3c0] sm:$0xf]  ;;  %v3987_v13 = vld [vmem:[%s4489_s29 + $0x3d0] sm:$0xf0]  ;;  %v3383_v19 = vor.u32 %v3947_v11, %v3382_v10  ;;  %v4040_v22 = vld [vmem:[#allocation6 + $0x78] sm:$0xff]  ;;  %s4290_s21 = scalar_lea.hbm %s4289_s6, 512  ;;  %p4295_p8 = scmp.lt.s32.totalorder %s4289_s6, %s5187_s3 }
  0x31   : > { %4071 = vmatpush.bf16.msra.mxu3 %v4031_v1  ;;  %1746 = vmatpush.bf16.msra.mxu0 %v4031_v1  ;;  %v3062_v14 = vld [vmem:[%s4489_s29] sm:$0xf]  ;;  %v3867_v15 = vld [vmem:[%s4489_s29 + $0x10] sm:$0xf0]  ;;  %v3543_v20 = vor.u32 %v3987_v13, %v3542_v12  ;;  %v4064_v23 = vld [vmem:[#allocation6 + $0x138] sm:$0xff]  ;;  %p4291_p1 = scmp.ne.s32.totalorder %s4289_s6, %s4290_s21  ;;  %s4294_s9 = scalar_lea.hbm %s5187_s3, 8192 }
  0x32   : > { %v3063_v21 = vor.u32 %v3867_v15, %v3062_v14  ;;  %v4047_v24 = vld [vmem:[#allocation6 + $0xb0] sm:$0xff]  ;;  %v4046_v28 = vld [vmem:[#allocation6 + $0xa8] sm:$0xff]  ;;  %v3912_v33 = vld [vmem:[%s4489_s29 + $0x178] sm:$0xf0]  ;;  %p4296_p10 = scmp.lt.s32.totalorder %s4294_s9, %s4290_s21 }
  0x33   : > { %v4055_v25 = vld [vmem:[#allocation6 + $0xf0] sm:$0xff]  ;;  %v4054_v29 = vld [vmem:[#allocation6 + $0xe8] sm:$0xff]  ;;  %v3952_v35 = vld [vmem:[%s4489_s29 + $0x2b8] sm:$0xf0]  ;;  %p4292_p2 = pnand %p4291_p1, %p4468_p5 }
  0x34   : > { %4072 = vmatpush.bf16.msra.mxu1 %v4030_v2  ;;  %4073 = vmatpush.bf16.msra.mxu2 %v4030_v2  ;;  %v4039_v26 = vld [vmem:[#allocation6 + $0x70] sm:$0xff]  ;;  %v4038_v30 = vld [vmem:[#allocation6 + $0x68] sm:$0xff]  ;;  %v3992_v37 = vld [vmem:[%s4489_s29 + $0x3f8] sm:$0xf0]  ;;  %p4297_p11 = por %p4296_p10, %p4295_p8 }
  0x35   : > { %4074 = vmatpush.bf16.msra.mxu3 %v4030_v2  ;;  %1747 = vmatpush.bf16.msra.mxu0 %v4030_v2  ;;  %v4063_v27 = vld [vmem:[#allocation6 + $0x130] sm:$0xff]  ;;  %v4062_v31 = vld [vmem:[#allocation6 + $0x128] sm:$0xff]  ;;  %v3872_v39 = vld [vmem:[%s4489_s29 + $0x38] sm:$0xf0]  ;;  %p4293_p4 = pneg %p4292_p2 }
  0x36   : > { %v3242_v32 = vld [vmem:[%s4489_s29 + $0x168] sm:$0xf]  ;;  %v4045_v44 = vld [vmem:[#allocation6 + $0xa0] sm:$0xff]  ;;  %v3262_v48 = vld [vmem:[%s4489_s29 + $0x190] sm:$0xf] }
  0x37   : > { %v3402_v34 = vld [vmem:[%s4489_s29 + $0x2a8] sm:$0xf]  ;;  %v3243_v40 = vor.u32 %v3912_v33, %v3242_v32  ;;  %v4053_v45 = vld [vmem:[#allocation6 + $0xe0] sm:$0xff]  ;;  %v3422_v50 = vld [vmem:[%s4489_s29 + $0x2d0] sm:$0xf]  ;;  %p4298_p12 = pnand %p4297_p11, %p4293_p4 }
  0x38   : > { %4075 = vmatpush.bf16.msra.mxu1 %v4029_v3  ;;  %4076 = vmatpush.bf16.msra.mxu2 %v4029_v3  ;;  %v3562_v36 = vld [vmem:[%s4489_s29 + $0x3e8] sm:$0xf]  ;;  %v3403_v41 = vor.u32 %v3952_v35, %v3402_v34  ;;  %v4037_v46 = vld [vmem:[#allocation6 + $0x60] sm:$0xff]  ;;  %v3582_v52 = vld [vmem:[%s4489_s29 + $0x410] sm:$0xf] }
  0x39   : > { %4077 = vmatpush.bf16.msra.mxu3 %v4029_v3  ;;  %1748 = vmatpush.bf16.msra.mxu0 %v4029_v3  ;;  %v3082_v38 = vld [vmem:[%s4489_s29 + $0x28] sm:$0xf]  ;;  %v3563_v42 = vor.u32 %v3992_v37, %v3562_v36  ;;  %v4061_v47 = vld [vmem:[#allocation6 + $0x120] sm:$0xff]  ;;  %v3102_v54 = vld [vmem:[%s4489_s29 + $0x50] sm:$0xf] }
  0x3a   : > { %v3083_v43 = vor.u32 %v3872_v39, %v3082_v38  ;;  %v3917_v49 = vld [vmem:[%s4489_s29 + $0x1a0] sm:$0xf0]  ;;  %v4044_v60 = vld [vmem:[#allocation6 + $0x98] sm:$0xff]  ;;  %v3922_v1 = vld [vmem:[%s4489_s29 + $0x1c8] sm:$0xf0] }
  0x3b   : > { %v3957_v51 = vld [vmem:[%s4489_s29 + $0x2e0] sm:$0xf0]  ;;  %v3263_v56 = vor.u32 %v3917_v49, %v3262_v48  ;;  %v4052_v61 = vld [vmem:[#allocation6 + $0xd8] sm:$0xff]  ;;  %v3962_v3 = vld [vmem:[%s4489_s29 + $0x308] sm:$0xf0] }
  0x3c   : > { %4078 = vmatpush.bf16.msra.mxu1 %v4028_v4  ;;  %4079 = vmatpush.bf16.msra.mxu2 %v4028_v4  ;;  %v3997_v53 = vld [vmem:[%s4489_s29 + $0x420] sm:$0xf0]  ;;  %v3423_v57 = vor.u32 %v3957_v51, %v3422_v50  ;;  %v4036_v62 = vld [vmem:[#allocation6 + $0x58] sm:$0xff]  ;;  %v4043_v12 = vld [vmem:[#allocation6 + $0x90] sm:$0xff] }
  0x3d   : > { %4080 = vmatpush.bf16.msra.mxu3 %v4028_v4  ;;  %1749 = vmatpush.bf16.msra.mxu0 %v4028_v4  ;;  %v3877_v55 = vld [vmem:[%s4489_s29 + $0x60] sm:$0xf0]  ;;  %v3583_v58 = vor.u32 %v3997_v53, %v3582_v52  ;;  %v4060_v63 = vld [vmem:[#allocation6 + $0x118] sm:$0xff]  ;;  %v4051_v13 = vld [vmem:[#allocation6 + $0xd0] sm:$0xff] }
  0x3e   : > { %v3103_v59 = vor.u32 %v3877_v55, %v3102_v54  ;;  %v3282_v0 = vld [vmem:[%s4489_s29 + $0x1b8] sm:$0xf]  ;;  %v4035_v14 = vld [vmem:[#allocation6 + $0x50] sm:$0xff]  ;;  %v3322_v32 = vld [vmem:[%s4489_s29 + $0x208] sm:$0xf] }
  0x3f   : > { %v3442_v2 = vld [vmem:[%s4489_s29 + $0x2f8] sm:$0xf]  ;;  %v3283_v8 = vor.u32 %v3922_v1, %v3282_v0  ;;  %v4059_v15 = vld [vmem:[#allocation6 + $0x110] sm:$0xff]  ;;  %v3932_v33 = vld [vmem:[%s4489_s29 + $0x218] sm:$0xf0] }
  0x40   : > { %4081 = vmatpush.bf16.msra.mxu1 %v4027_v5  ;;  %4082 = vmatpush.bf16.msra.mxu2 %v4027_v5  ;;  %v3602_v4 = vld [vmem:[%s4489_s29 + $0x438] sm:$0xf]  ;;  %v3443_v9 = vor.u32 %v3962_v3, %v3442_v2  ;;  %v3482_v34 = vld [vmem:[%s4489_s29 + $0x348] sm:$0xf]  ;;  %v3972_v35 = vld [vmem:[%s4489_s29 + $0x358] sm:$0xf0] }
  0x41   : > { %4083 = vmatpush.bf16.msra.mxu3 %v4027_v5  ;;  %1750 = vmatpush.bf16.msra.mxu0 %v4027_v5  ;;  %v4002_v5 = vld [vmem:[%s4489_s29 + $0x448] sm:$0xf0]  ;;  %v3642_v36 = vld [vmem:[%s4489_s29 + $0x488] sm:$0xf]  ;;  %v4012_v37 = vld [vmem:[%s4489_s29 + $0x498] sm:$0xf0] }
  0x42   : > { %v3603_v10 = vor.u32 %v4002_v5, %v3602_v4  ;;  %v3162_v38 = vld [vmem:[%s4489_s29 + $0xc8] sm:$0xf]  ;;  %v3892_v39 = vld [vmem:[%s4489_s29 + $0xd8] sm:$0xf0]  ;;  %v3342_v48 = vld [vmem:[%s4489_s29 + $0x230] sm:$0xf] }
  0x43   : > { %v3937_v49 = vld [vmem:[%s4489_s29 + $0x240] sm:$0xf0]  ;;  %v3502_v50 = vld [vmem:[%s4489_s29 + $0x370] sm:$0xf]  ;;  %v3682_v0 = vld [vmem:[%s4489_s29 + $0x4d8] sm:$0xf] }
  0x44   : > { %4084 = vmatpush.bf16.msra.mxu1 %v4026_v6  ;;  %4085 = vmatpush.bf16.msra.mxu2 %v4026_v6  ;;  %v3977_v51 = vld [vmem:[%s4489_s29 + $0x380] sm:$0xf0]  ;;  %v3662_v52 = vld [vmem:[%s4489_s29 + $0x4b0] sm:$0xf]  ;;  %v4022_v1 = vld [vmem:[%s4489_s29 + $0x4e8] sm:$0xf0] }
  0x45   : > { %4086 = vmatpush.bf16.msra.mxu3 %v4026_v6  ;;  %1751 = vmatpush.bf16.msra.mxu0 %v4026_v6  ;;  %v3122_v6 = vld [vmem:[%s4489_s29 + $0x78] sm:$0xf]  ;;  %v4017_v53 = vld [vmem:[%s4489_s29 + $0x4c0] sm:$0xf0]  ;;  %v3182_v54 = vld [vmem:[%s4489_s29 + $0xf0] sm:$0xf] }
  0x46   : > { %v3897_v55 = vld [vmem:[%s4489_s29 + $0x100] sm:$0xf0]  ;;  %v3202_v2 = vld [vmem:[%s4489_s29 + $0x118] sm:$0xf]  ;;  %v3902_v3 = vld [vmem:[%s4489_s29 + $0x128] sm:$0xf0] }
  0x48   : > { %4087 = vmatpush.bf16.msra.mxu1 %v4025_v7  ;;  %4088 = vmatpush.bf16.msra.mxu2 %v4025_v7 }
  0x49   : > { %4089 = vmatpush.bf16.msra.mxu3 %v4025_v7  ;;  %1752 = vmatpush.bf16.msra.mxu0 %v4025_v7  ;;  %v3882_v7 = vld [vmem:[%s4489_s29 + $0x88] sm:$0xf0] }
  0x4a   : > { %v3123_v11 = vor.u32 %v3882_v7, %v3122_v6  ;;  %v3683_v6 = vor.u32 %v4022_v1, %v3682_v0  ;;  %v3203_v7 = vor.u32 %v3902_v3, %v3202_v2  ;;  %v3880_v2 = vld [vmem:[%s4489_s29 + $0x7c] sm:$0xf]  ;;  %v3124_v3 = vld [vmem:[%s4489_s29 + $0x8c] sm:$0xf0] }
  0x4b   : > { %1793 = vmatmul.bf16.vlgmr.msra.gmra.mxu1 %v3223_v18  ;;  %1833 = vmatmul.bf16.vlgmr.msra.gmra.mxu2 %v3383_v19  ;;  %v3462_v18 = vld [vmem:[%s4489_s29 + $0x320] sm:$0xf]  ;;  %v3967_v19 = vld [vmem:[%s4489_s29 + $0x330] sm:$0xf0] }
  0x4c   : > { %2083 = vmatpush.bf16.msrb.mxu2 %v4048_v16  ;;  %1873 = vmatmul.bf16.vlgmr.msra.gmra.mxu3 %v3543_v20  ;;  %v3302_v16 = vld [vmem:[%s4489_s29 + $0x1e0] sm:$0xf] }
  0x4d   : > { %2252 = vmatpush.bf16.msrb.mxu3 %v4056_v17  ;;  %1753 = vmatmul.bf16.vlgmr.msra.gmra.mxu0 %v3063_v21  ;;  %v3927_v17 = vld [vmem:[%s4489_s29 + $0x1f0] sm:$0xf0]  ;;  %v3622_v20 = vld [vmem:[%s4489_s29 + $0x460] sm:$0xf] }
  0x4e   : > { %1914 = vmatpush.bf16.msrb.mxu1 %v4040_v22  ;;  %2421 = vmatpush.bf16.msrb.mxu0 %v4064_v23  ;;  %v4007_v21 = vld [vmem:[%s4489_s29 + $0x470] sm:$0xf0]  ;;  %v3142_v22 = vld [vmem:[%s4489_s29 + $0xa0] sm:$0xf] }
  0x4f   : > { %v3887_v23 = vld [vmem:[%s4489_s29 + $0xb0] sm:$0xf0] }
  0x50   : > { %2084 = vmatpush.bf16.msrb.mxu2 %v4047_v24  ;;  %v3303_v24 = vor.u32 %v3927_v17, %v3302_v16 }
  0x51   : > { %2253 = vmatpush.bf16.msrb.mxu3 %v4055_v25  ;;  %v3463_v25 = vor.u32 %v3967_v19, %v3462_v18 }
  0x52   : > { %1915 = vmatpush.bf16.msrb.mxu1 %v4039_v26  ;;  %2422 = vmatpush.bf16.msrb.mxu0 %v4063_v27  ;;  %v3623_v26 = vor.u32 %v4007_v21, %v3622_v20  ;;  %v3143_v27 = vor.u32 %v3887_v23, %v3142_v22 }
  0x54   : > { %2085 = vmatpush.bf16.msrb.mxu2 %v4046_v28  ;;  %v4042_v28 = vld [vmem:[#allocation6 + $0x88] sm:$0xff] }
  0x55   : > { %2254 = vmatpush.bf16.msrb.mxu3 %v4054_v29  ;;  %v4050_v29 = vld [vmem:[#allocation6 + $0xc8] sm:$0xff] }
  0x56   : > { %1916 = vmatpush.bf16.msrb.mxu1 %v4038_v30  ;;  %2423 = vmatpush.bf16.msrb.mxu0 %v4062_v31  ;;  %v4034_v30 = vld [vmem:[#allocation6 + $0x48] sm:$0xff] }
  0x57   : > { %v4058_v31 = vld [vmem:[#allocation6 + $0x108] sm:$0xff] }
  0x58   : > { %2086 = vmatpush.bf16.msrb.mxu2 %v4045_v44  ;;  %v4041_v44 = vld [vmem:[#allocation6 + $0x80] sm:$0xff] }
  0x59   : > { %2255 = vmatpush.bf16.msrb.mxu3 %v4053_v45  ;;  %v4049_v45 = vld [vmem:[#allocation6 + $0xc0] sm:$0xff] }
  0x5a   : > { %1917 = vmatpush.bf16.msrb.mxu1 %v4037_v46  ;;  %2424 = vmatpush.bf16.msrb.mxu0 %v4061_v47  ;;  %v4033_v46 = vld [vmem:[#allocation6 + $0x40] sm:$0xff] }
  0x5b   : > { %1798 = vmatmul.bf16.gmra.mxu1 %v3243_v40  ;;  %1838 = vmatmul.bf16.gmra.mxu2 %v3403_v41  ;;  %v3323_v40 = vor.u32 %v3932_v33, %v3322_v32  ;;  %v3483_v41 = vor.u32 %v3972_v35, %v3482_v34  ;;  %v4057_v47 = vld [vmem:[#allocation6 + $0x100] sm:$0xff]  ;;  %v3098_v32 = vld [vmem:[%s4489_s29 + $0x38] sm:$0xf]  ;;  %v3874_v33 = vld [vmem:[%s4489_s29 + $0x48] sm:$0xf0] }
  0x5c   : > { %1878 = vmatmul.bf16.gmra.mxu3 %v3563_v42  ;;  %2087 = vmatpush.bf16.msrb.mxu2 %v4044_v60  ;;  %v3643_v42 = vor.u32 %v4012_v37, %v3642_v36  ;;  %v3362_v60 = vld [vmem:[%s4489_s29 + $0x258] sm:$0xf] }
  0x5d   : > { %1758 = vmatmul.bf16.gmra.mxu0 %v3083_v43  ;;  %2256 = vmatpush.bf16.msrb.mxu3 %v4052_v61  ;;  %v3163_v43 = vor.u32 %v3892_v39, %v3162_v38  ;;  %v3942_v61 = vld [vmem:[%s4489_s29 + $0x268] sm:$0xf0] }
  0x5e   : > { %1918 = vmatpush.bf16.msrb.mxu1 %v4036_v62  ;;  %2425 = vmatpush.bf16.msrb.mxu0 %v4060_v63  ;;  %v3522_v62 = vld [vmem:[%s4489_s29 + $0x398] sm:$0xf]  ;;  %v3982_v63 = vld [vmem:[%s4489_s29 + $0x3a8] sm:$0xf0]  ;;  %v3363_v4 = vor.u32 %v3942_v61, %v3362_v60 }
  0x5f   : > { %v3523_v5 = vor.u32 %v3982_v63, %v3522_v62 }
  0x60   : > { %2088 = vmatpush.bf16.msrb.mxu2 %v4043_v12  ;;  %v3866_v12 = vld [vmem:[%s4489_s29 + $0xc] sm:$0xf] }
  0x61   : > { %2257 = vmatpush.bf16.msrb.mxu3 %v4051_v13  ;;  %v3072_v13 = vld [vmem:[%s4489_s29 + $0x1c] sm:$0xf0] }
  0x62   : > { %1919 = vmatpush.bf16.msrb.mxu1 %v4035_v14  ;;  %2426 = vmatpush.bf16.msrb.mxu0 %v4059_v15  ;;  %v3078_v14 = vld [vmem:[%s4489_s29 + $0x10] sm:$0xf]  ;;  %v3869_v15 = vld [vmem:[%s4489_s29 + $0x20] sm:$0xf0]  ;;  %v3075_v19 = vor.u32 %v3866_v12, %v3072_v13  ;;  %v3127_v12 = vor.u32 %v3880_v2, %v3124_v3 }
  0x63   : > { %v3079_v20 = vor.u32 %v3869_v15, %v3078_v14  ;;  %v3170_v2 = vld [vmem:[%s4489_s29 + $0xd0] sm:$0xf]  ;;  %v3893_v3 = vld [vmem:[%s4489_s29 + $0xe0] sm:$0xf0] }
  0x64   : > { %2089 = vmatpush.bf16.msrb.mxu2 %v4042_v28  ;;  %v3090_v28 = vld [vmem:[%s4489_s29 + $0x30] sm:$0xf] }
  0x65   : > { %2258 = vmatpush.bf16.msrb.mxu3 %v4050_v29  ;;  %v3873_v29 = vld [vmem:[%s4489_s29 + $0x40] sm:$0xf0] }
  0x66   : > { %1920 = vmatpush.bf16.msrb.mxu1 %v4034_v30  ;;  %2427 = vmatpush.bf16.msrb.mxu0 %v4058_v31  ;;  %v3871_v30 = vld [vmem:[%s4489_s29 + $0x34] sm:$0xf]  ;;  %v3092_v31 = vld [vmem:[%s4489_s29 + $0x44] sm:$0xf0]  ;;  %v3091_v37 = vor.u32 %v3873_v29, %v3090_v28  ;;  %v3885_v28 = vld [vmem:[%s4489_s29 + $0xa4] sm:$0xf] }
  0x67   : > { %v3095_v39 = vor.u32 %v3871_v30, %v3092_v31  ;;  %v3144_v29 = vld [vmem:[%s4489_s29 + $0xb4] sm:$0xf0]  ;;  %v3150_v30 = vld [vmem:[%s4489_s29 + $0xa8] sm:$0xf]  ;;  %v3888_v31 = vld [vmem:[%s4489_s29 + $0xb8] sm:$0xf0] }
  0x68   : > { %2090 = vmatpush.bf16.msrb.mxu2 %v4041_v44 }
  0x69   : > { %2259 = vmatpush.bf16.msrb.mxu3 %v4049_v45 }
  0x6a   : > { %1921 = vmatpush.bf16.msrb.mxu1 %v4033_v46  ;;  %2428 = vmatpush.bf16.msrb.mxu0 %v4057_v47  ;;  %v3875_v46 = vld [vmem:[%s4489_s29 + $0x54] sm:$0xf]  ;;  %v3104_v47 = vld [vmem:[%s4489_s29 + $0x64] sm:$0xf0] }
  0x6b   : > { %1803 = vmatmul.bf16.gmra.mxu1 %v3263_v56  ;;  %1843 = vmatmul.bf16.gmra.mxu2 %v3423_v57  ;;  %v3343_v56 = vor.u32 %v3937_v49, %v3342_v48  ;;  %v3503_v57 = vor.u32 %v3977_v51, %v3502_v50  ;;  %v3110_v48 = vld [vmem:[%s4489_s29 + $0x58] sm:$0xf]  ;;  %v3878_v49 = vld [vmem:[%s4489_s29 + $0x68] sm:$0xf0]  ;;  %v3876_v50 = vld [vmem:[%s4489_s29 + $0x5c] sm:$0xf] }
  0x6c   : > { %1883 = vmatmul.bf16.gmra.mxu3 %v3583_v58  ;;  %v3663_v58 = vor.u32 %v4017_v53, %v3662_v52  ;;  %v3112_v51 = vld [vmem:[%s4489_s29 + $0x6c] sm:$0xf0]  ;;  %v3118_v52 = vld [vmem:[%s4489_s29 + $0x60] sm:$0xf]  ;;  %v3879_v53 = vld [vmem:[%s4489_s29 + $0x70] sm:$0xf0] }
  0x6d   : > { %1763 = vmatmul.bf16.gmra.mxu0 %v3103_v59  ;;  %v3183_v59 = vor.u32 %v3897_v55, %v3182_v54  ;;  %v3119_v60 = vor.u32 %v3879_v53, %v3118_v52 }
  0x7b   : > { %1808 = vmatmul.bf16.gmra.mxu1 %v3283_v8  ;;  %1848 = vmatmul.bf16.gmra.mxu2 %v3443_v9  ;;  %v3865_v8 = vld [vmem:[%s4489_s29 + $0x4] sm:$0xf]  ;;  %v3064_v9 = vld [vmem:[%s4489_s29 + $0x14] sm:$0xf0] }
  0x7c   : > { %1888 = vmatmul.bf16.gmra.mxu3 %v3603_v10  ;;  %v3070_v10 = vld [vmem:[%s4489_s29 + $0x8] sm:$0xf]  ;;  %v3067_v16 = vor.u32 %v3865_v8, %v3064_v9  ;;  %v3884_v9 = vld [vmem:[%s4489_s29 + $0x98] sm:$0xf0] }
  0x7d   : > { %1768 = vmatmul.bf16.gmra.mxu0 %v3123_v11  ;;  %v3868_v11 = vld [vmem:[%s4489_s29 + $0x18] sm:$0xf0]  ;;  %v3138_v8 = vld [vmem:[%s4489_s29 + $0x88] sm:$0xf] }
  0x7e   : > { %v3071_v17 = vor.u32 %v3868_v11, %v3070_v10 }
  0x8b   : > { %1813 = vmatmul.bf16.gmra.mxu1 %v3303_v24  ;;  %1853 = vmatmul.bf16.gmra.mxu2 %v3463_v25 }
  0x8c   : > { %1893 = vmatmul.bf16.gmra.mxu3 %v3623_v26  ;;  %v3870_v26 = vld [vmem:[%s4489_s29 + $0x2c] sm:$0xf] }
  0x8d   : > { %1773 = vmatmul.bf16.gmra.mxu0 %v3143_v27  ;;  %v3084_v27 = vld [vmem:[%s4489_s29 + $0x3c] sm:$0xf0] }
  0x8e   : > { %v3087_v36 = vor.u32 %v3870_v26, %v3084_v27 }
  0x9b   : > { %1818 = vmatmul.bf16.gmra.mxu1 %v3323_v40  ;;  %1858 = vmatmul.bf16.gmra.mxu2 %v3483_v41  ;;  %v3099_v40 = vor.u32 %v3874_v33, %v3098_v32  ;;  %v3886_v32 = vld [vmem:[%s4489_s29 + $0xac] sm:$0xf]  ;;  %v3152_v33 = vld [vmem:[%s4489_s29 + $0xbc] sm:$0xf0] }
  0x9c   : > { %1898 = vmatmul.bf16.gmra.mxu3 %v3643_v42 }
  0x9d   : > { %1778 = vmatmul.bf16.gmra.mxu0 %v3163_v43 }
  0xab   : > { %1823 = vmatmul.bf16.gmra.mxu1 %v3343_v56  ;;  %1863 = vmatmul.bf16.gmra.mxu2 %v3503_v57  ;;  %v3107_v56 = vor.u32 %v3875_v46, %v3104_v47  ;;  %v3111_v57 = vor.u32 %v3878_v49, %v3110_v48  ;;  %v3147_v46 = vor.u32 %v3885_v28, %v3144_v29 }
  0xac   : > { %1903 = vmatmul.bf16.gmra.mxu3 %v3663_v58  ;;  %v3151_v47 = vor.u32 %v3888_v31, %v3150_v30  ;;  %v3155_v49 = vor.u32 %v3886_v32, %v3152_v33 }
  0xad   : > { %1783 = vmatmul.bf16.gmra.mxu0 %v3183_v59  ;;  %v3115_v59 = vor.u32 %v3876_v50, %v3112_v51 }
  0xbb   : > { %1828 = vmatmul.bf16.gmra.mxu1 %v3363_v4  ;;  %1868 = vmatmul.bf16.gmra.mxu2 %v3523_v5  ;;  %v3130_v4 = vld [vmem:[%s4489_s29 + $0x80] sm:$0xf]  ;;  %v3883_v5 = vld [vmem:[%s4489_s29 + $0x90] sm:$0xf0] }
  0xbc   : > { %1908 = vmatmul.bf16.gmra.mxu3 %v3683_v6  ;;  %v3881_v6 = vld [vmem:[%s4489_s29 + $0x84] sm:$0xf]  ;;  %v3131_v13 = vor.u32 %v3883_v5, %v3130_v4  ;;  %v3891_v4 = vld [vmem:[%s4489_s29 + $0xd4] sm:$0xf]  ;;  %v3172_v5 = vld [vmem:[%s4489_s29 + $0xe4] sm:$0xf0] }
  0xbd   : > { %1788 = vmatmul.bf16.gmra.mxu0 %v3203_v7  ;;  %v3132_v7 = vld [vmem:[%s4489_s29 + $0x94] sm:$0xf0] }
  0xbe   : > { %v3135_v15 = vor.u32 %v3881_v6, %v3132_v7  ;;  %v3178_v6 = vld [vmem:[%s4489_s29 + $0xd8] sm:$0xf]  ;;  %v3894_v7 = vld [vmem:[%s4489_s29 + $0xe8] sm:$0xf0] }
  0xbf   : > { %v3179_v28 = vor.u32 %v3894_v7, %v3178_v6 }
  0xc8   : > { %v4571_v18 = vpop.f32.mrf.mxu1 }
  0xca   : > { %v4573_v21 = vpop.f32.mrf.mxu0 }
  0xcb   : > { %1922 = vmatmul.bf16.vlgmr.msrb.gmra.mxu1 %v3067_v16  ;;  %2091 = vmatmul.bf16.vlgmr.msrb.gmra.mxu2 %v3071_v17  ;;  %v3139_v16 = vor.u32 %v3884_v9, %v3138_v8 }
  0xcc   : > { %2260 = vmatmul.bf16.vlgmr.msrb.gmra.mxu3 %v3075_v19 }
  0xcd   : > { %2429 = vmatmul.bf16.vlgmr.msrb.gmra.mxu0 %v3079_v20 }
  0xce   : > { %v4575_v22 = vpop.f32.mrf.mxu2 }
  0xcf   : > { %v4577_v23 = vpop.f32.mrf.mxu3 }
  0xd0   : > { %5194 = vst [vmem:[#allocation13_spill] sm:$0xff] %v4577_v23  ;;  %v4579_v24 = vpop.f32.mrf.mxu1 }
  0xd2   : > { %v4581_v25 = vpop.f32.mrf.mxu0 }
  0xd6   : > { %v4591_v34 = vpop.f32.mrf.mxu2 }
  0xd7   : > { %v4593_v35 = vpop.f32.mrf.mxu3 }
  0xd8   : > { %5195 = vst [vmem:[#allocation14_spill] sm:$0xff] %v4593_v35  ;;  %v4595_v38 = vpop.f32.mrf.mxu1 }
  0xda   : > { %v4597_v41 = vpop.f32.mrf.mxu0 }
  0xdb   : > { %1927 = vmatmul.bf16.gmra.mxu1 %v3087_v36  ;;  %2096 = vmatmul.bf16.gmra.mxu2 %v3091_v37  ;;  %v3158_v36 = vld [vmem:[%s4489_s29 + $0xb0] sm:$0xf]  ;;  %v3889_v37 = vld [vmem:[%s4489_s29 + $0xc0] sm:$0xf0] }
  0xdc   : > { %2265 = vmatmul.bf16.gmra.mxu3 %v3095_v39  ;;  %v3159_v50 = vor.u32 %v3889_v37, %v3158_v36  ;;  %v3895_v36 = vld [vmem:[%s4489_s29 + $0xf4] sm:$0xf]  ;;  %v3184_v37 = vld [vmem:[%s4489_s29 + $0x104] sm:$0xf0] }
  0xdd   : > { %2434 = vmatmul.bf16.gmra.mxu0 %v3099_v40 }
  0xde   : > { %v4599_v42 = vpop.f32.mrf.mxu2 }
  0xdf   : > { %v4601_v43 = vpop.f32.mrf.mxu3 }
  0xe0   : > { %5196 = vst [vmem:[#allocation15_spill] sm:$0xff] %v4601_v43  ;;  %v4603_v44 = vpop.f32.mrf.mxu1 }
  0xe2   : > { %v4605_v45 = vpop.f32.mrf.mxu0 }
  0xe6   : > { %v4615_v54 = vpop.f32.mrf.mxu2 }
  0xe7   : > { %v4617_v55 = vpop.f32.mrf.mxu3 }
  0xe8   : > { %5197 = vst [vmem:[#allocation16_spill] sm:$0xff] %v4617_v55  ;;  %v4619_v58 = vpop.f32.mrf.mxu1 }
  0xea   : > { %v4621_v61 = vpop.f32.mrf.mxu0 }
  0xeb   : > { %1932 = vmatmul.bf16.gmra.mxu1 %v3107_v56  ;;  %2101 = vmatmul.bf16.gmra.mxu2 %v3111_v57 }
  0xec   : > { %2270 = vmatmul.bf16.gmra.mxu3 %v3115_v59  ;;  %v3890_v59 = vld [vmem:[%s4489_s29 + $0xcc] sm:$0xf] }
  0xed   : > { %2439 = vmatmul.bf16.gmra.mxu0 %v3119_v60  ;;  %v3164_v60 = vld [vmem:[%s4489_s29 + $0xdc] sm:$0xf0] }
  0xee   : > { %v4623_v62 = vpop.f32.mrf.mxu2 }
  0xef   : > { %v4625_v63 = vpop.f32.mrf.mxu3 }
  0xf0   : > { %5198 = vst [vmem:[#allocation17_spill] sm:$0xff] %v4625_v63  ;;  %v4627_v0 = vpop.f32.mrf.mxu1  ;;  %v3909_v63 = vld [vmem:[%s4489_s29 + $0x160] sm:$0xf0] }
  0xf2   : > { %v4629_v1 = vpop.f32.mrf.mxu0 }
  0xf6   : > { %v4639_v10 = vpop.f32.mrf.mxu2 }
  0xf7   : > { %v4641_v11 = vpop.f32.mrf.mxu3 }
  0xf8   : > { %5199 = vst [vmem:[#allocation18_spill] sm:$0xff] %v4641_v11  ;;  %v4643_v14 = vpop.f32.mrf.mxu1  ;;  %v3238_v11 = vld [vmem:[%s4489_s29 + $0x150] sm:$0xf] }
  0xf9   : > { %v3239_v43 = vor.u32 %v3909_v63, %v3238_v11 }
  0xfa   : > { %v4645_v17 = vpop.f32.mrf.mxu0 }
  0xfb   : > { %1937 = vmatmul.bf16.gmra.mxu1 %v3127_v12  ;;  %2106 = vmatmul.bf16.gmra.mxu2 %v3131_v13  ;;  %v3167_v12 = vor.u32 %v3890_v59, %v3164_v60  ;;  %v3171_v13 = vor.u32 %v3893_v3, %v3170_v2  ;;  %v3198_v59 = vld [vmem:[%s4489_s29 + $0x100] sm:$0xf]  ;;  %v3899_v60 = vld [vmem:[%s4489_s29 + $0x110] sm:$0xf0] }
  0xfc   : > { %2275 = vmatmul.bf16.gmra.mxu3 %v3135_v15 }
  0xfd   : > { %2444 = vmatmul.bf16.gmra.mxu0 %v3139_v16  ;;  %v3175_v16 = vor.u32 %v3891_v4, %v3172_v5  ;;  %v3187_v4 = vor.u32 %v3895_v36, %v3184_v37 }
  0xfe   : > { %v4647_v19 = vpop.f32.mrf.mxu2 }
  0xff   : > { %v4649_v20 = vpop.f32.mrf.mxu3 }
 0x100   : > { %5200 = vst [vmem:[#allocation19_spill] sm:$0xff] %v4649_v20  ;;  %v4651_v26 = vpop.f32.mrf.mxu1  ;;  %v3232_v20 = vld [vmem:[%s4489_s29 + $0x15c] sm:$0xf0] }
 0x102   : > { %v4653_v27 = vpop.f32.mrf.mxu0 }
 0x106   : > { %v4663_v39 = vpop.f32.mrf.mxu2 }
 0x107   : > { %v4665_v40 = vpop.f32.mrf.mxu3 }
 0x108   : > { %5201 = vst [vmem:[#allocation20_spill] sm:$0xff] %v4665_v40  ;;  %v4667_v48 = vpop.f32.mrf.mxu1 }
 0x10a   : > { %v4669_v51 = vpop.f32.mrf.mxu0 }
 0x10b   : > { %1942 = vmatmul.bf16.gmra.mxu1 %v3147_v46  ;;  %2111 = vmatmul.bf16.gmra.mxu2 %v3151_v47  ;;  %v3190_v46 = vld [vmem:[%s4489_s29 + $0xf8] sm:$0xf]  ;;  %v3898_v47 = vld [vmem:[%s4489_s29 + $0x108] sm:$0xf0] }
 0x10c   : > { %2280 = vmatmul.bf16.gmra.mxu3 %v3155_v49  ;;  %v3896_v49 = vld [vmem:[%s4489_s29 + $0xfc] sm:$0xf]  ;;  %v3191_v5 = vor.u32 %v3898_v47, %v3190_v46  ;;  %v3204_v47 = vld [vmem:[%s4489_s29 + $0x12c] sm:$0xf0] }
 0x10d   : > { %2449 = vmatmul.bf16.gmra.mxu0 %v3159_v50  ;;  %v3192_v50 = vld [vmem:[%s4489_s29 + $0x10c] sm:$0xf0]  ;;  %v3900_v46 = vld [vmem:[%s4489_s29 + $0x11c] sm:$0xf] }
 0x10e   : > { %v4671_v52 = vpop.f32.mrf.mxu2  ;;  %v3195_v7 = vor.u32 %v3896_v49, %v3192_v50  ;;  %v3210_v49 = vld [vmem:[%s4489_s29 + $0x120] sm:$0xf]  ;;  %v3903_v50 = vld [vmem:[%s4489_s29 + $0x130] sm:$0xf0] }
 0x10f   : > { %v4673_v53 = vpop.f32.mrf.mxu3 }
 0x110   : > { %5202 = vst [vmem:[#allocation21_spill] sm:$0xff] %v4673_v53  ;;  %v4675_v56 = vpop.f32.mrf.mxu1 }
 0x112   : > { %v4677_v57 = vpop.f32.mrf.mxu0 }
 0x116   : > { %v4687_v8 = vpop.f32.mrf.mxu2 }
 0x117   : > { %v4689_v9 = vpop.f32.mrf.mxu3 }
 0x118   : > { %5203 = vst [vmem:[#allocation22_spill] sm:$0xff] %v4689_v9  ;;  %v4691_v15 = vpop.f32.mrf.mxu1 }
 0x11a   : > { %v4693_v29 = vpop.f32.mrf.mxu0 }
 0x11b   : > { %1947 = vmatmul.bf16.gmra.mxu1 %v3167_v12  ;;  %2116 = vmatmul.bf16.gmra.mxu2 %v3171_v13  ;;  %v3199_v12 = vor.u32 %v3899_v60, %v3198_v59  ;;  %v3901_v59 = vld [vmem:[%s4489_s29 + $0x124] sm:$0xf]  ;;  %v3212_v60 = vld [vmem:[%s4489_s29 + $0x134] sm:$0xf0] }
 0x11c   : > { %2285 = vmatmul.bf16.gmra.mxu3 %v3175_v16  ;;  %v3215_v9 = vor.u32 %v3901_v59, %v3212_v60  ;;  %v3224_v59 = vld [vmem:[%s4489_s29 + $0x154] sm:$0xf0]  ;;  %v3230_v60 = vld [vmem:[%s4489_s29 + $0x148] sm:$0xf] }
 0x11d   : > { %2454 = vmatmul.bf16.gmra.mxu0 %v3179_v28 }
 0x11e   : > { %v4695_v30 = vpop.f32.mrf.mxu2 }
 0x11f   : > { %5204 = vst [vmem:[#allocation23_spill] sm:$0xff] %v4695_v30  ;;  %v4697_v31 = vpop.f32.mrf.mxu3 }
 0x120   : > { %5205 = vst [vmem:[#allocation24_spill] sm:$0xff] %v4697_v31  ;;  %v4699_v32 = vpop.f32.mrf.mxu1  ;;  %v3904_v31 = vld [vmem:[%s4489_s29 + $0x138] sm:$0xf0] }
 0x122   : > { %v4701_v33 = vpop.f32.mrf.mxu0 }
 0x126   : > { %v4711_v2 = vpop.f32.mrf.mxu2 }
 0x127   : > { %5206 = vst [vmem:[#allocation25_spill] sm:$0xff] %v4711_v2  ;;  %v4713_v3 = vpop.f32.mrf.mxu3 }
 0x128   : > { %5207 = vst [vmem:[#allocation26_spill] sm:$0xff] %v4713_v3  ;;  %v4715_v6 = vpop.f32.mrf.mxu1  ;;  %v3218_v3 = vld [vmem:[%s4489_s29 + $0x128] sm:$0xf] }
 0x129   : > { %v3219_v53 = vor.u32 %v3904_v31, %v3218_v3  ;;  %v3908_v31 = vld [vmem:[%s4489_s29 + $0x158] sm:$0xf0]  ;;  %v3906_v3 = vld [vmem:[%s4489_s29 + $0x14c] sm:$0xf] }
 0x12a   : > { %v4717_v13 = vpop.f32.mrf.mxu0  ;;  %v3235_v55 = vor.u32 %v3906_v3, %v3232_v20  ;;  %v4765_v20 = vld [vmem:[#allocation8] ss:$0 sm:$0xff] }
 0x12b   : > { %1952 = vmatmul.bf16.gmra.mxu1 %v3187_v4  ;;  %2121 = vmatmul.bf16.gmra.mxu2 %v3191_v5  ;;  %v3244_v3 = vld [vmem:[%s4489_s29 + $0x17c] sm:$0xf0] }
 0x12c   : > { %2290 = vmatmul.bf16.gmra.mxu3 %v3195_v7  ;;  %v3207_v7 = vor.u32 %v3900_v46, %v3204_v47 }
 0x12d   : > { %2459 = vmatmul.bf16.gmra.mxu0 %v3199_v12  ;;  %v3211_v12 = vor.u32 %v3903_v50, %v3210_v49  ;;  %v3905_v50 = vld [vmem:[%s4489_s29 + $0x144] sm:$0xf] }
 0x12e   : > { %v4719_v16 = vpop.f32.mrf.mxu2 }
 0x12f   : > { %5208 = vst [vmem:[#allocation27_spill] sm:$0xff] %v4719_v16  ;;  %v4721_v28 = vpop.f32.mrf.mxu3 }
 0x130   : > { %5209 = vst [vmem:[#allocation28_spill] sm:$0xff] %v4721_v28  ;;  %v4723_v36 = vpop.f32.mrf.mxu1 }
 0x132   : > { %v4725_v37 = vpop.f32.mrf.mxu0 }
 0x136   : > { %v4735_v4 = vpop.f32.mrf.mxu2 }
 0x137   : > { %5210 = vst [vmem:[#allocation29_spill] sm:$0xff] %v4735_v4  ;;  %v4737_v5 = vpop.f32.mrf.mxu3 }
 0x138   : > { %5211 = vst [vmem:[#allocation30_spill] sm:$0xff] %v4737_v5  ;;  %v4739_v28 = vpop.f32.mrf.mxu1 }
 0x13a   : > { %v4741_v40 = vpop.f32.mrf.mxu0 }
 0x13b   : > { %1957 = vmatmul.bf16.gmra.mxu1 %v3207_v7  ;;  %2126 = vmatmul.bf16.gmra.mxu2 %v3211_v12  ;;  %v3231_v12 = vor.u32 %v3908_v31, %v3230_v60  ;;  %v3910_v31 = vld [vmem:[%s4489_s29 + $0x16c] sm:$0xf] }
 0x13c   : > { %2295 = vmatmul.bf16.gmra.mxu3 %v3215_v9  ;;  %v3227_v9 = vor.u32 %v3905_v50, %v3224_v59 }
 0x13d   : > { %2464 = vmatmul.bf16.gmra.mxu0 %v3219_v53 }
 0x13e   : > { %v4743_v5 = vpop.f32.mrf.mxu2 }
 0x13f   : > { %5212 = vst [vmem:[#allocation31_spill] sm:$0xff] %v4743_v5  ;;  %v4745_v46 = vpop.f32.mrf.mxu3 }
 0x140   : > { %5213 = vst [vmem:[#allocation32_spill] sm:$0xff] %v4745_v46  ;;  %v4747_v47 = vpop.f32.mrf.mxu1 }
 0x142   : > { %v4749_v49 = vpop.f32.mrf.mxu0 }
 0x146   : > { %v4759_v7 = vpop.f32.mrf.mxu2 }
 0x147   : > { %5214 = vst [vmem:[#allocation33_spill] sm:$0xff] %v4759_v7  ;;  %v4761_v53 = vpop.f32.mrf.mxu3 }
 0x148   : > { %5215 = vst [vmem:[#allocation34_spill] sm:$0xff] %v4761_v53  ;;  %v1923_v46 = vpop.f32.mrf.mxu1 }
 0x149   : > { %v1924_v23 = vadd.f32 %v1923_v46, %v4573_v21 }
 0x14a   : > { %v2430_v35 = vpop.f32.mrf.mxu0 }
 0x14b   : > { %1962 = vmatmul.bf16.gmra.mxu1 %v3227_v9  ;;  %2131 = vmatmul.bf16.gmra.mxu2 %v3231_v12  ;;  %v3913_v9 = vld [vmem:[%s4489_s29 + $0x180] sm:$0xf0]  ;;  %v3914_v12 = vld [vmem:[%s4489_s29 + $0x188] sm:$0xf0] }
 0x14c   : > { %2300 = vmatmul.bf16.gmra.mxu3 %v3235_v55  ;;  %v3250_v55 = vld [vmem:[%s4489_s29 + $0x170] sm:$0xf] }
 0x14d   : > { %2469 = vmatmul.bf16.gmra.mxu0 %v3239_v43  ;;  %v3911_v43 = vld [vmem:[%s4489_s29 + $0x174] sm:$0xf] }
 0x14e   : > { %v2092_v7 = vpop.f32.mrf.mxu2 }
 0x14f   : > { %v2093_v53 = vadd.f32 %v2092_v7, %v1924_v23  ;;  %v2261_v50 = vpop.f32.mrf.mxu3  ;;  %v3252_v23 = vld [vmem:[%s4489_s29 + $0x184] sm:$0xf0]  ;;  %v3258_v7 = vld [vmem:[%s4489_s29 + $0x178] sm:$0xf] }
 0x150   : > { %v1925_v63 = vpop.f32.mrf.mxu1  ;;  %v3255_v16 = vor.u32 %v3911_v43, %v3252_v23  ;;  %v3259_v2 = vor.u32 %v3914_v12, %v3258_v7  ;;  %v3916_v23 = vld [vmem:[%s4489_s29 + $0x19c] sm:$0xf]  ;;  %v3278_v12 = vld [vmem:[%s4489_s29 + $0x1a0] sm:$0xf] }
 0x151   : > { %v2262_v11 = vadd.f32 %v2261_v50, %v2093_v53  ;;  %v1926_v46 = vadd.f32 %v1925_v63, %v4581_v25 }
 0x152   : > { %v2432_v59 = vpop.f32.mrf.mxu0 }
 0x153   : > { %v2431_v60 = vadd.f32 %v2430_v35, %v2262_v11  ;;  %v3247_v35 = vor.u32 %v3910_v31, %v3244_v3  ;;  %v3251_v11 = vor.u32 %v3913_v9, %v3250_v55 }
 0x155   : > { %v2789_v21 = vadd.f32 %v4765_v20, %v2431_v60 }
 0x156   : > { %v2094_v5 = vpop.f32.mrf.mxu2 }
 0x157   : > { %2853 = vst [vmem:[%s4777_s22] sm:$0xff] %v2789_v21  ;;  %v2095_v53 = vadd.f32 %v2094_v5, %v1926_v46  ;;  %v2263_v50 = vpop.f32.mrf.mxu3  ;;  %v3915_v21 = vld [vmem:[%s4489_s29 + $0x194] sm:$0xf]  ;;  %v3270_v46 = vld [vmem:[%s4489_s29 + $0x198] sm:$0xf] }
 0x158   : > { %v1928_v4 = vpop.f32.mrf.mxu1 }
 0x159   : > { %v2264_v30 = vadd.f32 %v2263_v50, %v2095_v53  ;;  %v1929_v63 = vadd.f32 %v1928_v4, %v4597_v41  ;;  %v3272_v4 = vld [vmem:[%s4489_s29 + $0x1ac] sm:$0xf0]  ;;  %v3919_v53 = vld [vmem:[%s4489_s29 + $0x1b0] sm:$0xf0] }
 0x15a   : > { %v2435_v60 = vpop.f32.mrf.mxu0 }
 0x15b   : > { %v2433_v25 = vadd.f32 %v2432_v59, %v2264_v30  ;;  %1967 = vmatmul.bf16.gmra.mxu1 %v3247_v35  ;;  %2136 = vmatmul.bf16.gmra.mxu2 %v3251_v11 }
 0x15c   : > { %2305 = vmatmul.bf16.gmra.mxu3 %v3255_v16  ;;  %v3264_v16 = vld [vmem:[%s4489_s29 + $0x1a4] sm:$0xf0] }
 0x15d   : > { %2474 = vmatmul.bf16.gmra.mxu0 %v3259_v2  ;;  %v2790_v5 = vadd.f32 %v4765_v20, %v2433_v25  ;;  %v3918_v2 = vld [vmem:[%s4489_s29 + $0x1a8] sm:$0xf0]  ;;  %v3267_v25 = vor.u32 %v3915_v21, %v3264_v16 }
 0x15e   : > { %v2097_v31 = vpop.f32.mrf.mxu2 }
 0x15f   : > { %2854 = vst [vmem:[%s4777_s22 + $0x8] sm:$0xff] %v2790_v5  ;;  %v2098_v3 = vadd.f32 %v2097_v31, %v1929_v63  ;;  %v2266_v55 = vpop.f32.mrf.mxu3  ;;  %v3271_v5 = vor.u32 %v3918_v2, %v3270_v46  ;;  %v3275_v63 = vor.u32 %v3916_v23, %v3272_v4  ;;  %v3279_v31 = vor.u32 %v3919_v53, %v3278_v12  ;;  %v3290_v4 = vld [vmem:[%s4489_s29 + $0x1c0] sm:$0xf]  ;;  %v3923_v12 = vld [vmem:[%s4489_s29 + $0x1d0] sm:$0xf0] }
 0x160   : > { %v1930_v30 = vpop.f32.mrf.mxu1  ;;  %v3921_v53 = vld [vmem:[%s4489_s29 + $0x1c4] sm:$0xf] }
 0x161   : > { %v2267_v59 = vadd.f32 %v2266_v55, %v2098_v3  ;;  %v1931_v41 = vadd.f32 %v1930_v30, %v4605_v45 }
 0x162   : > { %v2437_v9 = vpop.f32.mrf.mxu0 }
 0x163   : > { %v2436_v43 = vadd.f32 %v2435_v60, %v2267_v59 }
 0x165   : > { %v2791_v7 = vadd.f32 %v4765_v20, %v2436_v43 }
 0x166   : > { %v2099_v50 = vpop.f32.mrf.mxu2 }
 0x167   : > { %2855 = vst [vmem:[%s4777_s22 + $0x10] sm:$0xff] %v2791_v7  ;;  %v2100_v35 = vadd.f32 %v2099_v50, %v1931_v41  ;;  %v2268_v11 = vpop.f32.mrf.mxu3  ;;  %v3920_v7 = vld [vmem:[%s4489_s29 + $0x1bc] sm:$0xf]  ;;  %v3284_v41 = vld [vmem:[%s4489_s29 + $0x1cc] sm:$0xf0] }
 0x168   : > { %v1933_v60 = vpop.f32.mrf.mxu1 }
 0x169   : > { %v2269_v3 = vadd.f32 %v2268_v11, %v2100_v35  ;;  %v1934_v30 = vadd.f32 %v1933_v60, %v4621_v61  ;;  %v3292_v35 = vld [vmem:[%s4489_s29 + $0x1d4] sm:$0xf0]  ;;  %v3298_v11 = vld [vmem:[%s4489_s29 + $0x1c8] sm:$0xf] }
 0x16a   : > { %v2440_v55 = vpop.f32.mrf.mxu0 }
 0x16b   : > { %v2438_v59 = vadd.f32 %v2437_v9, %v2269_v3  ;;  %1972 = vmatmul.bf16.gmra.mxu1 %v3267_v25  ;;  %2141 = vmatmul.bf16.gmra.mxu2 %v3271_v5  ;;  %v3924_v25 = vld [vmem:[%s4489_s29 + $0x1d8] sm:$0xf0]  ;;  %v3291_v3 = vor.u32 %v3923_v12, %v3290_v4  ;;  %v3925_v12 = vld [vmem:[%s4489_s29 + $0x1e4] sm:$0xf] }
 0x16c   : > { %2310 = vmatmul.bf16.gmra.mxu3 %v3275_v63 }
 0x16d   : > { %2479 = vmatmul.bf16.gmra.mxu0 %v3279_v31  ;;  %v2792_v45 = vadd.f32 %v4765_v20, %v2438_v59  ;;  %v3287_v31 = vor.u32 %v3920_v7, %v3284_v41  ;;  %v3295_v59 = vor.u32 %v3921_v53, %v3292_v35  ;;  %v3304_v53 = vld [vmem:[%s4489_s29 + $0x1f4] sm:$0xf0]  ;;  %v3926_v35 = vld [vmem:[%s4489_s29 + $0x1ec] sm:$0xf] }
 0x16e   : > { %v2102_v43 = vpop.f32.mrf.mxu2 }
 0x16f   : > { %2856 = vst [vmem:[%s4777_s22 + $0x18] sm:$0xff] %v2792_v45  ;;  %v2103_v21 = vadd.f32 %v2102_v43, %v1934_v30  ;;  %v2271_v16 = vpop.f32.mrf.mxu3  ;;  %v3299_v45 = vor.u32 %v3924_v25, %v3298_v11  ;;  %v3312_v25 = vld [vmem:[%s4489_s29 + $0x1fc] sm:$0xf0] }
 0x170   : > { %v1935_v9 = vpop.f32.mrf.mxu1 }
 0x171   : > { %v2272_v46 = vadd.f32 %v2271_v16, %v2103_v21  ;;  %v1936_v61 = vadd.f32 %v1935_v9, %v4629_v1 }
 0x172   : > { %v2442_v2 = vpop.f32.mrf.mxu0 }
 0x173   : > { %v2441_v23 = vadd.f32 %v2440_v55, %v2272_v46 }
 0x175   : > { %v2793_v50 = vadd.f32 %v4765_v20, %v2441_v23 }
 0x176   : > { %v2104_v5 = vpop.f32.mrf.mxu2 }
 0x177   : > { %2857 = vst [vmem:[%s4777_s22 + $0x20] sm:$0xff] %v2793_v50  ;;  %v2105_v60 = vadd.f32 %v2104_v5, %v1936_v61  ;;  %v2273_v63 = vpop.f32.mrf.mxu3  ;;  %v3310_v50 = vld [vmem:[%s4489_s29 + $0x1e8] sm:$0xf]  ;;  %v3928_v61 = vld [vmem:[%s4489_s29 + $0x1f8] sm:$0xf0] }
 0x178   : > { %v1938_v55 = vpop.f32.mrf.mxu1  ;;  %v3318_v5 = vld [vmem:[%s4489_s29 + $0x1f0] sm:$0xf] }
 0x179   : > { %v2274_v30 = vadd.f32 %v2273_v63, %v2105_v60  ;;  %v1939_v16 = vadd.f32 %v1938_v55, %v4645_v17  ;;  %v3929_v60 = vld [vmem:[%s4489_s29 + $0x200] sm:$0xf0]  ;;  %v3307_v55 = vor.u32 %v3925_v12, %v3304_v53  ;;  %v3930_v53 = vld [vmem:[%s4489_s29 + $0x20c] sm:$0xf] }
 0x17a   : > { %v2445_v43 = vpop.f32.mrf.mxu0 }
 0x17b   : > { %v2443_v21 = vadd.f32 %v2442_v2, %v2274_v30  ;;  %1977 = vmatmul.bf16.gmra.mxu1 %v3287_v31  ;;  %2146 = vmatmul.bf16.gmra.mxu2 %v3291_v3  ;;  %v3315_v30 = vor.u32 %v3926_v35, %v3312_v25  ;;  %v3933_v35 = vld [vmem:[%s4489_s29 + $0x220] sm:$0xf0]  ;;  %v3332_v25 = vld [vmem:[%s4489_s29 + $0x224] sm:$0xf0] }
 0x17c   : > { %2315 = vmatmul.bf16.gmra.mxu3 %v3295_v59  ;;  %v3311_v59 = vor.u32 %v3928_v61, %v3310_v50  ;;  %v3324_v50 = vld [vmem:[%s4489_s29 + $0x21c] sm:$0xf0]  ;;  %v3330_v61 = vld [vmem:[%s4489_s29 + $0x210] sm:$0xf] }
 0x17d   : > { %2484 = vmatmul.bf16.gmra.mxu0 %v3299_v45  ;;  %v2794_v1 = vadd.f32 %v4765_v20, %v2443_v21 }
 0x17e   : > { %v2107_v9 = vpop.f32.mrf.mxu2 }
 0x17f   : > { %2858 = vst [vmem:[%s4777_s22 + $0x28] sm:$0xff] %v2794_v1  ;;  %v2108_v46 = vadd.f32 %v2107_v9, %v1939_v16  ;;  %v2276_v23 = vpop.f32.mrf.mxu3 }
 0x180   : > { %v1940_v2 = vpop.f32.mrf.mxu1 }
 0x181   : > { %v2277_v7 = vadd.f32 %v2276_v23, %v2108_v46  ;;  %v1941_v17 = vadd.f32 %v1940_v2, %v4653_v27 }
 0x182   : > { %v2447_v41 = vpop.f32.mrf.mxu0 }
 0x183   : > { %v2446_v4 = vadd.f32 %v2445_v43, %v2277_v7  ;;  %v3319_v43 = vor.u32 %v3929_v60, %v3318_v5  ;;  %v3338_v5 = vld [vmem:[%s4489_s29 + $0x218] sm:$0xf]  ;;  %v3934_v60 = vld [vmem:[%s4489_s29 + $0x228] sm:$0xf0] }
 0x185   : > { %v2795_v11 = vadd.f32 %v4765_v20, %v2446_v4 }
 0x186   : > { %v2109_v63 = vpop.f32.mrf.mxu2 }
 0x187   : > { %2859 = vst [vmem:[%s4777_s22 + $0x30] sm:$0xff] %v2795_v11  ;;  %v2110_v31 = vadd.f32 %v2109_v63, %v1941_v17  ;;  %v2278_v3 = vpop.f32.mrf.mxu3  ;;  %v3931_v11 = vld [vmem:[%s4489_s29 + $0x214] sm:$0xf] }
 0x188   : > { %v1943_v45 = vpop.f32.mrf.mxu1 }
 0x189   : > { %v2279_v21 = vadd.f32 %v2278_v3, %v2110_v31  ;;  %v1944_v9 = vadd.f32 %v1943_v45, %v4669_v51 }
 0x18a   : > { %v2450_v1 = vpop.f32.mrf.mxu0 }
 0x18b   : > { %v2448_v16 = vadd.f32 %v2447_v41, %v2279_v21  ;;  %1982 = vmatmul.bf16.gmra.mxu1 %v3307_v55  ;;  %2151 = vmatmul.bf16.gmra.mxu2 %v3311_v59  ;;  %v3327_v55 = vor.u32 %v3930_v53, %v3324_v50  ;;  %v3331_v59 = vor.u32 %v3933_v35, %v3330_v61  ;;  %v3344_v53 = vld [vmem:[%s4489_s29 + $0x244] sm:$0xf0]  ;;  %v3350_v50 = vld [vmem:[%s4489_s29 + $0x238] sm:$0xf]  ;;  %v3938_v61 = vld [vmem:[%s4489_s29 + $0x248] sm:$0xf0] }
 0x18c   : > { %2320 = vmatmul.bf16.gmra.mxu3 %v3315_v30  ;;  %v3335_v30 = vor.u32 %v3931_v11, %v3332_v25  ;;  %v3936_v35 = vld [vmem:[%s4489_s29 + $0x23c] sm:$0xf]  ;;  %v3939_v25 = vld [vmem:[%s4489_s29 + $0x250] sm:$0xf0] }
 0x18d   : > { %2489 = vmatmul.bf16.gmra.mxu0 %v3319_v43  ;;  %v2796_v27 = vadd.f32 %v4765_v20, %v2448_v16  ;;  %v3339_v43 = vor.u32 %v3934_v60, %v3338_v5 }
 0x18e   : > { %v2112_v46 = vpop.f32.mrf.mxu2 }
 0x18f   : > { %2860 = vst [vmem:[%s4777_s22 + $0x38] sm:$0xff] %v2796_v27  ;;  %v2113_v23 = vadd.f32 %v2112_v46, %v1944_v9  ;;  %v2281_v2 = vpop.f32.mrf.mxu3 }
 0x190   : > { %v1945_v7 = vpop.f32.mrf.mxu1 }
 0x191   : > { %v2282_v41 = vadd.f32 %v2281_v2, %v2113_v23  ;;  %v1946_v51 = vadd.f32 %v1945_v7, %v4677_v57 }
 0x192   : > { %v2452_v4 = vpop.f32.mrf.mxu0 }
 0x193   : > { %v2451_v12 = vadd.f32 %v2450_v1, %v2282_v41 }
 0x195   : > { %v2797_v17 = vadd.f32 %v4765_v20, %v2451_v12  ;;  %v3935_v12 = vld [vmem:[%s4489_s29 + $0x234] sm:$0xf] }
 0x196   : > { %v2114_v63 = vpop.f32.mrf.mxu2 }
 0x197   : > { %2861 = vst [vmem:[%s4777_s22 + $0x40] sm:$0xff] %v2797_v17  ;;  %v2115_v31 = vadd.f32 %v2114_v63, %v1946_v51  ;;  %v2283_v3 = vpop.f32.mrf.mxu3  ;;  %v3352_v17 = vld [vmem:[%s4489_s29 + $0x24c] sm:$0xf0]  ;;  %v3358_v51 = vld [vmem:[%s4489_s29 + $0x240] sm:$0xf] }
 0x198   : > { %v1948_v45 = vpop.f32.mrf.mxu1 }
 0x199   : > { %v2284_v21 = vadd.f32 %v2283_v3, %v2115_v31  ;;  %v1949_v27 = vadd.f32 %v1948_v45, %v4693_v29  ;;  %v3347_v31 = vor.u32 %v3935_v12, %v3344_v53  ;;  %v3351_v3 = vor.u32 %v3938_v61, %v3350_v50  ;;  %v3943_v12 = vld [vmem:[%s4489_s29 + $0x270] sm:$0xf0]  ;;  %v3941_v53 = vld [vmem:[%s4489_s29 + $0x264] sm:$0xf]  ;;  %v3372_v61 = vld [vmem:[%s4489_s29 + $0x274] sm:$0xf0] }
 0x19a   : > { %v2455_v1 = vpop.f32.mrf.mxu0  ;;  %v3359_v45 = vor.u32 %v3939_v25, %v3358_v51 }
 0x19b   : > { %v2453_v16 = vadd.f32 %v2452_v4, %v2284_v21  ;;  %1987 = vmatmul.bf16.gmra.mxu1 %v3327_v55  ;;  %2156 = vmatmul.bf16.gmra.mxu2 %v3331_v59  ;;  %v3355_v59 = vor.u32 %v3936_v35, %v3352_v17  ;;  %v3378_v35 = vld [vmem:[%s4489_s29 + $0x268] sm:$0xf] }
 0x19c   : > { %2325 = vmatmul.bf16.gmra.mxu3 %v3335_v30 }
 0x19d   : > { %2494 = vmatmul.bf16.gmra.mxu0 %v3339_v43  ;;  %v2798_v57 = vadd.f32 %v4765_v20, %v2453_v16 }
 0x19e   : > { %v2117_v9 = vpop.f32.mrf.mxu2 }
 0x19f   : > { %2862 = vst [vmem:[%s4777_s22 + $0x48] sm:$0xff] %v2798_v57  ;;  %v2118_v46 = vadd.f32 %v2117_v9, %v1949_v27  ;;  %v2286_v23 = vpop.f32.mrf.mxu3 }
 0x1a0   : > { %v1950_v2 = vpop.f32.mrf.mxu1 }
 0x1a1   : > { %v2287_v7 = vadd.f32 %v2286_v23, %v2118_v46  ;;  %v1951_v29 = vadd.f32 %v1950_v2, %v4701_v33 }
 0x1a2   : > { %v2457_v41 = vpop.f32.mrf.mxu0 }
 0x1a3   : > { %v2456_v4 = vadd.f32 %v2455_v1, %v2287_v7  ;;  %v3940_v7 = vld [vmem:[%s4489_s29 + $0x25c] sm:$0xf] }
 0x1a5   : > { %v2799_v11 = vadd.f32 %v4765_v20, %v2456_v4  ;;  %v3370_v4 = vld [vmem:[%s4489_s29 + $0x260] sm:$0xf] }
 0x1a6   : > { %v2119_v5 = vpop.f32.mrf.mxu2 }
 0x1a7   : > { %2863 = vst [vmem:[%s4777_s22 + $0x50] sm:$0xff] %v2799_v11  ;;  %v2120_v60 = vadd.f32 %v2119_v5, %v1951_v29  ;;  %v2288_v63 = vpop.f32.mrf.mxu3  ;;  %v3944_v11 = vld [vmem:[%s4489_s29 + $0x278] sm:$0xf0]  ;;  %v3371_v5 = vor.u32 %v3943_v12, %v3370_v4  ;;  %v3398_v4 = vld [vmem:[%s4489_s29 + $0x290] sm:$0xf] }
 0x1a8   : > { %v1953_v55 = vpop.f32.mrf.mxu1  ;;  %v3949_v12 = vld [vmem:[%s4489_s29 + $0x2a0] sm:$0xf0] }
 0x1a9   : > { %v2289_v30 = vadd.f32 %v2288_v63, %v2120_v60  ;;  %v1954_v1 = vadd.f32 %v1953_v55, %v4717_v13  ;;  %v3375_v63 = vor.u32 %v3941_v53, %v3372_v61 }
 0x1aa   : > { %v2460_v43 = vpop.f32.mrf.mxu0 }
 0x1ab   : > { %v2458_v21 = vadd.f32 %v2457_v41, %v2289_v30  ;;  %1992 = vmatmul.bf16.gmra.mxu1 %v3347_v31  ;;  %2161 = vmatmul.bf16.gmra.mxu2 %v3351_v3  ;;  %v3364_v41 = vld [vmem:[%s4489_s29 + $0x26c] sm:$0xf0]  ;;  %v3379_v31 = vor.u32 %v3944_v11, %v3378_v35 }
 0x1ac   : > { %2330 = vmatmul.bf16.gmra.mxu3 %v3355_v59  ;;  %v3367_v25 = vor.u32 %v3940_v7, %v3364_v41  ;;  %v3392_v41 = vld [vmem:[%s4489_s29 + $0x29c] sm:$0xf0] }
 0x1ad   : > { %2499 = vmatmul.bf16.gmra.mxu0 %v3359_v45  ;;  %v2800_v33 = vadd.f32 %v4765_v20, %v2458_v21 }
 0x1ae   : > { %v2122_v16 = vpop.f32.mrf.mxu2 }
 0x1af   : > { %2864 = vst [vmem:[%s4777_s22 + $0x58] sm:$0xff] %v2800_v33  ;;  %v2123_v57 = vadd.f32 %v2122_v16, %v1954_v1  ;;  %v2291_v27 = vpop.f32.mrf.mxu3 }
 0x1b0   : > { %v1955_v9 = vpop.f32.mrf.mxu1 }
 0x1b1   : > { %v2292_v46 = vadd.f32 %v2291_v27, %v2123_v57  ;;  %v1956_v13 = vadd.f32 %v1955_v9, %v4725_v37  ;;  %v3945_v27 = vld [vmem:[%s4489_s29 + $0x284] sm:$0xf]  ;;  %v3384_v9 = vld [vmem:[%s4489_s29 + $0x294] sm:$0xf0] }
 0x1b2   : > { %v2462_v23 = vpop.f32.mrf.mxu0  ;;  %v3387_v61 = vor.u32 %v3945_v27, %v3384_v9  ;;  %v3418_v27 = vld [vmem:[%s4489_s29 + $0x2b8] sm:$0xf]  ;;  %v3954_v9 = vld [vmem:[%s4489_s29 + $0x2c8] sm:$0xf0] }
 0x1b3   : > { %v2461_v2 = vadd.f32 %v2460_v43, %v2292_v46  ;;  %v3390_v46 = vld [vmem:[%s4489_s29 + $0x288] sm:$0xf] }
 0x1b5   : > { %v2801_v50 = vadd.f32 %v4765_v20, %v2461_v2  ;;  %v3946_v2 = vld [vmem:[%s4489_s29 + $0x28c] sm:$0xf] }
 0x1b6   : > { %v2124_v29 = vpop.f32.mrf.mxu2 }
 0x1b7   : > { %2865 = vst [vmem:[%s4777_s22 + $0x60] sm:$0xff] %v2801_v50  ;;  %v2125_v17 = vadd.f32 %v2124_v29, %v1956_v13  ;;  %v2293_v51 = vpop.f32.mrf.mxu3  ;;  %v3395_v29 = vor.u32 %v3946_v2, %v3392_v41 }
 0x1b8   : > { %v1958_v60 = vpop.f32.mrf.mxu1 }
 0x1b9   : > { %v2294_v3 = vadd.f32 %v2293_v51, %v2125_v17  ;;  %v1959_v45 = vadd.f32 %v1958_v60, %v4741_v40  ;;  %v3399_v17 = vor.u32 %v3949_v12, %v3398_v4  ;;  %v3419_v12 = vor.u32 %v3954_v9, %v3418_v27 }
 0x1ba   : > { %v2465_v55 = vpop.f32.mrf.mxu0 }
 0x1bb   : > { %v2463_v59 = vadd.f32 %v2462_v23, %v2294_v3  ;;  %1997 = vmatmul.bf16.gmra.mxu1 %v3367_v25  ;;  %2166 = vmatmul.bf16.gmra.mxu2 %v3371_v5  ;;  %v3948_v23 = vld [vmem:[%s4489_s29 + $0x298] sm:$0xf0] }
 0x1bc   : > { %2335 = vmatmul.bf16.gmra.mxu3 %v3375_v63  ;;  %v3391_v35 = vor.u32 %v3948_v23, %v3390_v46 }
 0x1bd   : > { %2504 = vmatmul.bf16.gmra.mxu0 %v3379_v31  ;;  %v2802_v37 = vadd.f32 %v4765_v20, %v2463_v59 }
 0x1be   : > { %v2127_v30 = vpop.f32.mrf.mxu2 }
 0x1bf   : > { %2866 = vst [vmem:[%s4777_s22 + $0x68] sm:$0xff] %v2802_v37  ;;  %v2128_v43 = vadd.f32 %v2127_v30, %v1959_v45  ;;  %v2296_v21 = vpop.f32.mrf.mxu3  ;;  %v3950_v30 = vld [vmem:[%s4489_s29 + $0x2ac] sm:$0xf] }
 0x1c0   : > { %v1960_v33 = vpop.f32.mrf.mxu1 }
 0x1c1   : > { %v2297_v1 = vadd.f32 %v2296_v21, %v2128_v43  ;;  %v1961_v40 = vadd.f32 %v1960_v33, %v4749_v49  ;;  %v3404_v43 = vld [vmem:[%s4489_s29 + $0x2bc] sm:$0xf0]  ;;  %v3410_v21 = vld [vmem:[%s4489_s29 + $0x2b0] sm:$0xf]  ;;  %v3953_v33 = vld [vmem:[%s4489_s29 + $0x2c0] sm:$0xf0] }
 0x1c2   : > { %v2467_v16 = vpop.f32.mrf.mxu0 }
 0x1c3   : > { %v2466_v57 = vadd.f32 %v2465_v55, %v2297_v1  ;;  %v3951_v1 = vld [vmem:[%s4489_s29 + $0x2b4] sm:$0xf] }
 0x1c5   : > { %v2803_v7 = vadd.f32 %v4765_v20, %v2466_v57  ;;  %v3412_v57 = vld [vmem:[%s4489_s29 + $0x2c4] sm:$0xf0] }
 0x1c6   : > { %v2129_v53 = vpop.f32.mrf.mxu2  ;;  %v3415_v4 = vor.u32 %v3951_v1, %v3412_v57 }
 0x1c7   : > { %2867 = vst [vmem:[%s4777_s22 + $0x70] sm:$0xff] %v2803_v7  ;;  %v2130_v50 = vadd.f32 %v2129_v53, %v1961_v40  ;;  %v2298_v13 = vpop.f32.mrf.mxu3  ;;  %v3407_v7 = vor.u32 %v3950_v30, %v3404_v43  ;;  %v3411_v40 = vor.u32 %v3953_v33, %v3410_v21 }
 0x1c8   : > { %v1963_v11 = vpop.f32.mrf.mxu1 }
 0x1c9   : > { %v2299_v51 = vadd.f32 %v2298_v13, %v2130_v50  ;;  %v1964_v60 = vadd.f32 %v1963_v11, %v4571_v18 }
 0x1ca   : > { %v2470_v25 = vpop.f32.mrf.mxu0 }
 0x1cb   : > { %v2468_v5 = vadd.f32 %v2467_v16, %v2299_v51  ;;  %2002 = vmatmul.bf16.gmra.mxu1 %v3387_v61  ;;  %2171 = vmatmul.bf16.gmra.mxu2 %v3391_v35 }
 0x1cc   : > { %2340 = vmatmul.bf16.gmra.mxu3 %v3395_v29 }
 0x1cd   : > { %2509 = vmatmul.bf16.gmra.mxu0 %v3399_v17  ;;  %v2804_v49 = vadd.f32 %v4765_v20, %v2468_v5 }
 0x1ce   : > { %v2132_v63 = vpop.f32.mrf.mxu2 }
 0x1cf   : > { %2868 = vst [vmem:[%s4777_s22 + $0x78] sm:$0xff] %v2804_v49  ;;  %v2133_v31 = vadd.f32 %v2132_v63, %v1964_v60  ;;  %v2301_v3 = vpop.f32.mrf.mxu3  ;;  %v3955_v49 = vld [vmem:[%s4489_s29 + $0x2d4] sm:$0xf]  ;;  %v3424_v60 = vld [vmem:[%s4489_s29 + $0x2e4] sm:$0xf0] }
 0x1d0   : > { %v1965_v55 = vpop.f32.mrf.mxu1  ;;  %v3430_v63 = vld [vmem:[%s4489_s29 + $0x2d8] sm:$0xf]  ;;  %v3427_v33 = vor.u32 %v3955_v49, %v3424_v60 }
 0x1d1   : > { %v2302_v59 = vadd.f32 %v2301_v3, %v2133_v31  ;;  %v1966_v18 = vadd.f32 %v1965_v55, %v4579_v24  ;;  %v3958_v31 = vld [vmem:[%s4489_s29 + $0x2e8] sm:$0xf0]  ;;  %v3956_v3 = vld [vmem:[%s4489_s29 + $0x2dc] sm:$0xf] }
 0x1d2   : > { %v2472_v37 = vpop.f32.mrf.mxu0  ;;  %v3431_v1 = vor.u32 %v3958_v31, %v3430_v63 }
 0x1d3   : > { %v2471_v45 = vadd.f32 %v2470_v25, %v2302_v59  ;;  %v3432_v59 = vld [vmem:[%s4489_s29 + $0x2ec] sm:$0xf0] }
 0x1d5   : > { %v2805_v16 = vadd.f32 %v4765_v20, %v2471_v45  ;;  %v3959_v45 = vld [vmem:[%s4489_s29 + $0x2f0] sm:$0xf0] }
 0x1d6   : > { %v2134_v46 = vpop.f32.mrf.mxu2 }
 0x1d7   : > { %2869 = vst [vmem:[%s4777_s22 + $0x80] sm:$0xff] %v2805_v16  ;;  %v2135_v23 = vadd.f32 %v2134_v46, %v1966_v18  ;;  %v2303_v2 = vpop.f32.mrf.mxu3  ;;  %v3435_v18 = vor.u32 %v3956_v3, %v3432_v59 }
 0x1d8   : > { %v1968_v41 = vpop.f32.mrf.mxu1 }
 0x1d9   : > { %v2304_v53 = vadd.f32 %v2303_v2, %v2135_v23  ;;  %v1969_v61 = vadd.f32 %v1968_v41, %v4595_v38 }
 0x1da   : > { %v2475_v50 = vpop.f32.mrf.mxu0 }
 0x1db   : > { %v2473_v13 = vadd.f32 %v2472_v37, %v2304_v53  ;;  %2007 = vmatmul.bf16.gmra.mxu1 %v3407_v7  ;;  %2176 = vmatmul.bf16.gmra.mxu2 %v3411_v40  ;;  %v3438_v37 = vld [vmem:[%s4489_s29 + $0x2e0] sm:$0xf] }
 0x1dc   : > { %2345 = vmatmul.bf16.gmra.mxu3 %v3415_v4  ;;  %v3439_v57 = vor.u32 %v3959_v45, %v3438_v37 }
 0x1dd   : > { %2514 = vmatmul.bf16.gmra.mxu0 %v3419_v12  ;;  %v2806_v24 = vadd.f32 %v4765_v20, %v2473_v13  ;;  %v3444_v13 = vld [vmem:[%s4489_s29 + $0x30c] sm:$0xf0] }
 0x1de   : > { %v2137_v35 = vpop.f32.mrf.mxu2 }
 0x1df   : > { %2870 = vst [vmem:[%s4777_s22 + $0x88] sm:$0xff] %v2806_v24  ;;  %v2138_v11 = vadd.f32 %v2137_v35, %v1969_v61  ;;  %v2306_v29 = vpop.f32.mrf.mxu3  ;;  %v3450_v24 = vld [vmem:[%s4489_s29 + $0x300] sm:$0xf]  ;;  %v3963_v61 = vld [vmem:[%s4489_s29 + $0x310] sm:$0xf0] }
 0x1e0   : > { %v1970_v17 = vpop.f32.mrf.mxu1  ;;  %v3961_v35 = vld [vmem:[%s4489_s29 + $0x304] sm:$0xf]  ;;  %v3451_v63 = vor.u32 %v3963_v61, %v3450_v24 }
 0x1e1   : > { %v2307_v51 = vadd.f32 %v2306_v29, %v2138_v11  ;;  %v1971_v38 = vadd.f32 %v1970_v17, %v4603_v44  ;;  %v3452_v29 = vld [vmem:[%s4489_s29 + $0x314] sm:$0xf0]  ;;  %v3458_v17 = vld [vmem:[%s4489_s29 + $0x308] sm:$0xf] }
 0x1e2   : > { %v2477_v25 = vpop.f32.mrf.mxu0  ;;  %v3455_v3 = vor.u32 %v3961_v35, %v3452_v29 }
 0x1e3   : > { %v2476_v5 = vadd.f32 %v2475_v50, %v2307_v51  ;;  %v3960_v50 = vld [vmem:[%s4489_s29 + $0x2fc] sm:$0xf] }
 0x1e4   : > { %v3964_v51 = vld [vmem:[%s4489_s29 + $0x318] sm:$0xf0]  ;;  %v3447_v60 = vor.u32 %v3960_v50, %v3444_v13 }
 0x1e5   : > { %v2807_v55 = vadd.f32 %v4765_v20, %v2476_v5 }
 0x1e6   : > { %v2139_v30 = vpop.f32.mrf.mxu2 }
 0x1e7   : > { %2871 = vst [vmem:[%s4777_s22 + $0x90] sm:$0xff] %v2807_v55  ;;  %v2140_v43 = vadd.f32 %v2139_v30, %v1971_v38  ;;  %v2308_v21 = vpop.f32.mrf.mxu3  ;;  %v3459_v55 = vor.u32 %v3964_v51, %v3458_v17 }
 0x1e8   : > { %v1973_v16 = vpop.f32.mrf.mxu1 }
 0x1e9   : > { %v2309_v27 = vadd.f32 %v2308_v21, %v2140_v43  ;;  %v1974_v23 = vadd.f32 %v1973_v16, %v4619_v58 }
 0x1ea   : > { %v2480_v9 = vpop.f32.mrf.mxu0 }
 0x1eb   : > { %v2478_v46 = vadd.f32 %v2477_v25, %v2309_v27  ;;  %2012 = vmatmul.bf16.gmra.mxu1 %v3427_v33  ;;  %2181 = vmatmul.bf16.gmra.mxu2 %v3431_v1  ;;  %v3464_v27 = vld [vmem:[%s4489_s29 + $0x334] sm:$0xf0] }
 0x1ec   : > { %2350 = vmatmul.bf16.gmra.mxu3 %v3435_v18 }
 0x1ed   : > { %2519 = vmatmul.bf16.gmra.mxu0 %v3439_v57  ;;  %v2808_v44 = vadd.f32 %v4765_v20, %v2478_v46  ;;  %v3965_v57 = vld [vmem:[%s4489_s29 + $0x324] sm:$0xf]  ;;  %v3968_v46 = vld [vmem:[%s4489_s29 + $0x338] sm:$0xf0] }
 0x1ee   : > { %v2142_v2 = vpop.f32.mrf.mxu2 }
 0x1ef   : > { %2872 = vst [vmem:[%s4777_s22 + $0x98] sm:$0xff] %v2808_v44  ;;  %v2143_v7 = vadd.f32 %v2142_v2, %v1974_v23  ;;  %v2311_v40 = vpop.f32.mrf.mxu3  ;;  %v3966_v44 = vld [vmem:[%s4489_s29 + $0x32c] sm:$0xf]  ;;  %v3472_v2 = vld [vmem:[%s4489_s29 + $0x33c] sm:$0xf0] }
 0x1f0   : > { %v1975_v41 = vpop.f32.mrf.mxu1  ;;  %v3475_v24 = vor.u32 %v3966_v44, %v3472_v2 }
 0x1f1   : > { %v2312_v4 = vadd.f32 %v2311_v40, %v2143_v7  ;;  %v1976_v58 = vadd.f32 %v1975_v41, %v4627_v0  ;;  %v3478_v7 = vld [vmem:[%s4489_s29 + $0x330] sm:$0xf]  ;;  %v3969_v40 = vld [vmem:[%s4489_s29 + $0x340] sm:$0xf0] }
 0x1f2   : > { %v2482_v12 = vpop.f32.mrf.mxu0  ;;  %v3479_v61 = vor.u32 %v3969_v40, %v3478_v7 }
 0x1f3   : > { %v2481_v53 = vadd.f32 %v2480_v9, %v2312_v4  ;;  %v3470_v9 = vld [vmem:[%s4489_s29 + $0x328] sm:$0xf] }
 0x1f4   : > { %v3471_v50 = vor.u32 %v3968_v46, %v3470_v9 }
 0x1f5   : > { %v2809_v11 = vadd.f32 %v4765_v20, %v2481_v53  ;;  %v3467_v53 = vor.u32 %v3965_v57, %v3464_v27 }
 0x1f6   : > { %v2144_v25 = vpop.f32.mrf.mxu2 }
 0x1f7   : > { %2873 = vst [vmem:[%s4777_s22 + $0xa0] sm:$0xff] %v2809_v11  ;;  %v2145_v5 = vadd.f32 %v2144_v25, %v1976_v58  ;;  %v2313_v49 = vpop.f32.mrf.mxu3 }
 0x1f8   : > { %v1978_v31 = vpop.f32.mrf.mxu1 }
 0x1f9   : > { %v2314_v38 = vadd.f32 %v2313_v49, %v2145_v5  ;;  %v1979_v45 = vadd.f32 %v1978_v31, %v4643_v14  ;;  %v3970_v31 = vld [vmem:[%s4489_s29 + $0x34c] sm:$0xf] }
 0x1fa   : > { %v2485_v59 = vpop.f32.mrf.mxu0 }
 0x1fb   : > { %v2483_v37 = vadd.f32 %v2482_v12, %v2314_v38  ;;  %2017 = vmatmul.bf16.gmra.mxu1 %v3447_v60  ;;  %2186 = vmatmul.bf16.gmra.mxu2 %v3451_v63  ;;  %v3973_v38 = vld [vmem:[%s4489_s29 + $0x360] sm:$0xf0] }
 0x1fc   : > { %2355 = vmatmul.bf16.gmra.mxu3 %v3455_v3  ;;  %v3484_v3 = vld [vmem:[%s4489_s29 + $0x35c] sm:$0xf0] }
 0x1fd   : > { %2524 = vmatmul.bf16.gmra.mxu0 %v3459_v55  ;;  %v2810_v0 = vadd.f32 %v4765_v20, %v2483_v37  ;;  %v3490_v55 = vld [vmem:[%s4489_s29 + $0x350] sm:$0xf] }
 0x1fe   : > { %v2147_v30 = vpop.f32.mrf.mxu2 }
 0x1ff   : > { %2874 = vst [vmem:[%s4777_s22 + $0xa8] sm:$0xff] %v2810_v0  ;;  %v2148_v43 = vadd.f32 %v2147_v30, %v1979_v45  ;;  %v2316_v21 = vpop.f32.mrf.mxu3  ;;  %v3492_v0 = vld [vmem:[%s4489_s29 + $0x364] sm:$0xf0]  ;;  %v3498_v45 = vld [vmem:[%s4489_s29 + $0x358] sm:$0xf] }
 0x200   : > { %v1980_v33 = vpop.f32.mrf.mxu1  ;;  %v3974_v30 = vld [vmem:[%s4489_s29 + $0x368] sm:$0xf0] }
 0x201   : > { %v2317_v1 = vadd.f32 %v2316_v21, %v2148_v43  ;;  %v1981_v14 = vadd.f32 %v1980_v33, %v4651_v26  ;;  %v3499_v27 = vor.u32 %v3974_v30, %v3498_v45 }
 0x202   : > { %v2487_v16 = vpop.f32.mrf.mxu0 }
 0x203   : > { %v2486_v18 = vadd.f32 %v2485_v59, %v2317_v1  ;;  %v3971_v59 = vld [vmem:[%s4489_s29 + $0x354] sm:$0xf]  ;;  %v3487_v1 = vor.u32 %v3970_v31, %v3484_v3 }
 0x204   : > { %v3495_v57 = vor.u32 %v3971_v59, %v3492_v0 }
 0x205   : > { %v2811_v23 = vadd.f32 %v4765_v20, %v2486_v18 }
 0x206   : > { %v2149_v41 = vpop.f32.mrf.mxu2 }
 0x207   : > { %2875 = vst [vmem:[%s4777_s22 + $0xb0] sm:$0xff] %v2811_v23  ;;  %v2150_v4 = vadd.f32 %v2149_v41, %v1981_v14  ;;  %v2318_v12 = vpop.f32.mrf.mxu3 }
 0x208   : > { %v1983_v13 = vpop.f32.mrf.mxu1 }
 0x209   : > { %v2319_v35 = vadd.f32 %v2318_v12, %v2150_v4  ;;  %v1984_v29 = vadd.f32 %v1983_v13, %v4667_v48  ;;  %v3510_v13 = vld [vmem:[%s4489_s29 + $0x378] sm:$0xf] }
 0x20a   : > { %v2490_v11 = vpop.f32.mrf.mxu0 }
 0x20b   : > { %v2488_v58 = vadd.f32 %v2487_v16, %v2319_v35  ;;  %2022 = vmatmul.bf16.gmra.mxu1 %v3467_v53  ;;  %2191 = vmatmul.bf16.gmra.mxu2 %v3471_v50  ;;  %v3491_v16 = vor.u32 %v3973_v38, %v3490_v55  ;;  %v3975_v53 = vld [vmem:[%s4489_s29 + $0x374] sm:$0xf]  ;;  %v3504_v50 = vld [vmem:[%s4489_s29 + $0x384] sm:$0xf0] }
 0x20c   : > { %2360 = vmatmul.bf16.gmra.mxu3 %v3475_v24  ;;  %v3978_v24 = vld [vmem:[%s4489_s29 + $0x388] sm:$0xf0] }
 0x20d   : > { %2529 = vmatmul.bf16.gmra.mxu0 %v3479_v61  ;;  %v2812_v26 = vadd.f32 %v4765_v20, %v2488_v58  ;;  %v3976_v61 = vld [vmem:[%s4489_s29 + $0x37c] sm:$0xf]  ;;  %v3518_v58 = vld [vmem:[%s4489_s29 + $0x380] sm:$0xf] }
 0x20e   : > { %v2152_v17 = vpop.f32.mrf.mxu2 }
 0x20f   : > { %2876 = vst [vmem:[%s4777_s22 + $0xb8] sm:$0xff] %v2812_v26  ;;  %v2153_v51 = vadd.f32 %v2152_v17, %v1984_v29  ;;  %v2321_v25 = vpop.f32.mrf.mxu3  ;;  %v3979_v26 = vld [vmem:[%s4489_s29 + $0x390] sm:$0xf0] }
 0x210   : > { %v1985_v5 = vpop.f32.mrf.mxu1 }
 0x211   : > { %v2322_v49 = vadd.f32 %v2321_v25, %v2153_v51  ;;  %v1986_v48 = vadd.f32 %v1985_v5, %v4675_v56  ;;  %v3507_v25 = vor.u32 %v3975_v53, %v3504_v50  ;;  %v3511_v5 = vor.u32 %v3978_v24, %v3510_v13 }
 0x212   : > { %v2492_v60 = vpop.f32.mrf.mxu0 }
 0x213   : > { %v2491_v63 = vadd.f32 %v2490_v11, %v2322_v49  ;;  %v3512_v11 = vld [vmem:[%s4489_s29 + $0x38c] sm:$0xf0] }
 0x215   : > { %v2813_v37 = vadd.f32 %v4765_v20, %v2491_v63  ;;  %v3519_v63 = vor.u32 %v3979_v26, %v3518_v58  ;;  %v3985_v26 = vld [vmem:[%s4489_s29 + $0x3c4] sm:$0xf] }
 0x216   : > { %v2154_v43 = vpop.f32.mrf.mxu2 }
 0x217   : > { %2877 = vst [vmem:[%s4777_s22 + $0xc0] sm:$0xff] %v2813_v37  ;;  %v2155_v21 = vadd.f32 %v2154_v43, %v1986_v48  ;;  %v2323_v33 = vpop.f32.mrf.mxu3 }
 0x218   : > { %v1988_v18 = vpop.f32.mrf.mxu1 }
 0x219   : > { %v2324_v9 = vadd.f32 %v2323_v33, %v2155_v21  ;;  %v1989_v23 = vadd.f32 %v1988_v18, %v4691_v15  ;;  %v3980_v21 = vld [vmem:[%s4489_s29 + $0x39c] sm:$0xf]  ;;  %v3524_v33 = vld [vmem:[%s4489_s29 + $0x3ac] sm:$0xf0]  ;;  %v3981_v18 = vld [vmem:[%s4489_s29 + $0x3a4] sm:$0xf] }
 0x21a   : > { %v2495_v46 = vpop.f32.mrf.mxu0 }
 0x21b   : > { %v2493_v44 = vadd.f32 %v2492_v60, %v2324_v9  ;;  %2027 = vmatmul.bf16.gmra.mxu1 %v3487_v1  ;;  %2196 = vmatmul.bf16.gmra.mxu2 %v3491_v16  ;;  %v3515_v60 = vor.u32 %v3976_v61, %v3512_v11  ;;  %v3530_v1 = vld [vmem:[%s4489_s29 + $0x3a0] sm:$0xf]  ;;  %v3983_v16 = vld [vmem:[%s4489_s29 + $0x3b0] sm:$0xf0]  ;;  %v3538_v9 = vld [vmem:[%s4489_s29 + $0x3a8] sm:$0xf] }
 0x21c   : > { %2365 = vmatmul.bf16.gmra.mxu3 %v3495_v57 }
 0x21d   : > { %2534 = vmatmul.bf16.gmra.mxu0 %v3499_v27  ;;  %v2814_v56 = vadd.f32 %v4765_v20, %v2493_v44  ;;  %v3532_v27 = vld [vmem:[%s4489_s29 + $0x3b4] sm:$0xf0] }
 0x21e   : > { %v2157_v14 = vpop.f32.mrf.mxu2 }
 0x21f   : > { %2878 = vst [vmem:[%s4777_s22 + $0xc8] sm:$0xff] %v2814_v56  ;;  %v2158_v2 = vadd.f32 %v2157_v14, %v1989_v23  ;;  %v2326_v7 = vpop.f32.mrf.mxu3  ;;  %v3527_v14 = vor.u32 %v3980_v21, %v3524_v33 }
 0x220   : > { %v1990_v40 = vpop.f32.mrf.mxu1 }
 0x221   : > { %v2327_v41 = vadd.f32 %v2326_v7, %v2158_v2  ;;  %v1991_v15 = vadd.f32 %v1990_v40, %v4699_v32  ;;  %v3531_v2 = vor.u32 %v3983_v16, %v3530_v1  ;;  %v3535_v40 = vor.u32 %v3981_v18, %v3532_v27  ;;  %v3990_v27 = vld [vmem:[%s4489_s29 + $0x3ec] sm:$0xf] }
 0x222   : > { %v2497_v4 = vpop.f32.mrf.mxu0 }
 0x223   : > { %v2496_v12 = vadd.f32 %v2495_v46, %v2327_v41  ;;  %v3984_v46 = vld [vmem:[%s4489_s29 + $0x3b8] sm:$0xf0] }
 0x224   : > { %v3539_v41 = vor.u32 %v3984_v46, %v3538_v9  ;;  %v3564_v9 = vld [vmem:[%s4489_s29 + $0x3fc] sm:$0xf0]  ;;  %v3570_v46 = vld [vmem:[%s4489_s29 + $0x3f0] sm:$0xf] }
 0x225   : > { %v2815_v35 = vadd.f32 %v4765_v20, %v2496_v12 }
 0x226   : > { %v2159_v29 = vpop.f32.mrf.mxu2 }
 0x227   : > { %2879 = vst [vmem:[%s4777_s22 + $0xd0] sm:$0xff] %v2815_v35  ;;  %v2160_v17 = vadd.f32 %v2159_v29, %v1991_v15  ;;  %v2328_v51 = vpop.f32.mrf.mxu3  ;;  %v3544_v29 = vld [vmem:[%s4489_s29 + $0x3d4] sm:$0xf0] }
 0x228   : > { %v1993_v49 = vpop.f32.mrf.mxu1 }
 0x229   : > { %v2329_v31 = vadd.f32 %v2328_v51, %v2160_v17  ;;  %v1994_v38 = vadd.f32 %v1993_v49, %v4715_v6  ;;  %v3550_v17 = vld [vmem:[%s4489_s29 + $0x3c8] sm:$0xf]  ;;  %v3988_v51 = vld [vmem:[%s4489_s29 + $0x3d8] sm:$0xf0]  ;;  %v3552_v49 = vld [vmem:[%s4489_s29 + $0x3dc] sm:$0xf0] }
 0x22a   : > { %v2500_v3 = vpop.f32.mrf.mxu0 }
 0x22b   : > { %v2498_v55 = vadd.f32 %v2497_v4, %v2329_v31  ;;  %2032 = vmatmul.bf16.gmra.mxu1 %v3507_v25  ;;  %2201 = vmatmul.bf16.gmra.mxu2 %v3511_v5  ;;  %v3986_v25 = vld [vmem:[%s4489_s29 + $0x3cc] sm:$0xf] }
 0x22c   : > { %2370 = vmatmul.bf16.gmra.mxu3 %v3515_v60  ;;  %v3558_v60 = vld [vmem:[%s4489_s29 + $0x3d0] sm:$0xf] }
 0x22d   : > { %2539 = vmatmul.bf16.gmra.mxu0 %v3519_v63  ;;  %v2816_v32 = vadd.f32 %v4765_v20, %v2498_v55  ;;  %v4970_v20 = vld [vmem:[#allocation8] ss:$0 sm:$0xff]  ;;  %v3989_v63 = vld [vmem:[%s4489_s29 + $0x3e0] sm:$0xf0] }
 0x22e   : > { %v2162_v59 = vpop.f32.mrf.mxu2 }
 0x22f   : > { %2880 = vst [vmem:[%s4777_s22 + $0xd8] sm:$0xff] %v2816_v32  ;;  %v2163_v37 = vadd.f32 %v2162_v59, %v1994_v38  ;;  %v2331_v48 = vpop.f32.mrf.mxu3  ;;  %v3547_v32 = vor.u32 %v3985_v26, %v3544_v29  ;;  %v3551_v38 = vor.u32 %v3988_v51, %v3550_v17 }
 0x230   : > { %v1995_v0 = vpop.f32.mrf.mxu1 }
 0x231   : > { %v2332_v45 = vadd.f32 %v2331_v48, %v2163_v37  ;;  %v1996_v57 = vadd.f32 %v1995_v0, %v4723_v36  ;;  %v3555_v37 = vor.u32 %v3986_v25, %v3552_v49  ;;  %v3559_v48 = vor.u32 %v3989_v63, %v3558_v60  ;;  %v3590_v49 = vld [vmem:[%s4489_s29 + $0x418] sm:$0xf]  ;;  %v3998_v60 = vld [vmem:[%s4489_s29 + $0x428] sm:$0xf0]  ;;  %v3996_v63 = vld [vmem:[%s4489_s29 + $0x41c] sm:$0xf] }
 0x232   : > { %v2502_v30 = vpop.f32.mrf.mxu0 }
 0x233   : > { %v2501_v43 = vadd.f32 %v2500_v3, %v2332_v45 }
 0x235   : > { %v2817_v6 = vadd.f32 %v4970_v20, %v2501_v43 }
 0x236   : > { %v2164_v44 = vpop.f32.mrf.mxu2 }
 0x237   : > { %2881 = vst [vmem:[%s4777_s22 + $0xe0] sm:$0xff] %v2817_v6  ;;  %v2165_v56 = vadd.f32 %v2164_v44, %v1996_v57  ;;  %v2333_v23 = vpop.f32.mrf.mxu3  ;;  %v3993_v44 = vld [vmem:[%s4489_s29 + $0x400] sm:$0xf0] }
 0x238   : > { %v1998_v7 = vpop.f32.mrf.mxu1 }
 0x239   : > { %v2334_v4 = vadd.f32 %v2333_v23, %v2165_v56  ;;  %v1999_v50 = vadd.f32 %v1998_v7, %v4739_v28  ;;  %v3991_v56 = vld [vmem:[%s4489_s29 + $0x3f4] sm:$0xf]  ;;  %v3994_v7 = vld [vmem:[%s4489_s29 + $0x408] sm:$0xf0] }
 0x23a   : > { %v2505_v12 = vpop.f32.mrf.mxu0 }
 0x23b   : > { %v2503_v53 = vadd.f32 %v2502_v30, %v2334_v4  ;;  %2037 = vmatmul.bf16.gmra.mxu1 %v3527_v14  ;;  %2206 = vmatmul.bf16.gmra.mxu2 %v3531_v2  ;;  %v3572_v14 = vld [vmem:[%s4489_s29 + $0x404] sm:$0xf0]  ;;  %v3578_v2 = vld [vmem:[%s4489_s29 + $0x3f8] sm:$0xf] }
 0x23c   : > { %2375 = vmatmul.bf16.gmra.mxu3 %v3535_v40 }
 0x23d   : > { %2544 = vmatmul.bf16.gmra.mxu0 %v3539_v41  ;;  %v2818_v36 = vadd.f32 %v4970_v20, %v2503_v53  ;;  %v3571_v53 = vor.u32 %v3993_v44, %v3570_v46  ;;  %v4000_v44 = vld [vmem:[%s4489_s29 + $0x43c] sm:$0xf] }
 0x23e   : > { %v2167_v13 = vpop.f32.mrf.mxu2 }
 0x23f   : > { %2882 = vst [vmem:[%s4777_s22 + $0xe8] sm:$0xff] %v2818_v36  ;;  %v2168_v24 = vadd.f32 %v2167_v13, %v1999_v50  ;;  %v2336_v61 = vpop.f32.mrf.mxu3  ;;  %v3575_v50 = vor.u32 %v3991_v56, %v3572_v14  ;;  %v3579_v13 = vor.u32 %v3994_v7, %v3578_v2  ;;  %v3604_v56 = vld [vmem:[%s4489_s29 + $0x44c] sm:$0xf0]  ;;  %v4001_v14 = vld [vmem:[%s4489_s29 + $0x444] sm:$0xf] }
 0x240   : > { %v2000_v35 = vpop.f32.mrf.mxu1  ;;  %v3612_v7 = vld [vmem:[%s4489_s29 + $0x454] sm:$0xf0] }
 0x241   : > { %v2337_v15 = vadd.f32 %v2336_v61, %v2168_v24  ;;  %v2001_v28 = vadd.f32 %v2000_v35, %v4747_v47 }
 0x242   : > { %v2507_v11 = vpop.f32.mrf.mxu0 }
 0x243   : > { %v2506_v58 = vadd.f32 %v2505_v12, %v2337_v15  ;;  %v3567_v12 = vor.u32 %v3990_v27, %v3564_v9 }
 0x245   : > { %v2819_v5 = vadd.f32 %v4970_v20, %v2506_v58 }
 0x246   : > { %v2169_v31 = vpop.f32.mrf.mxu2 }
 0x247   : > { %2883 = vst [vmem:[%s4777_s22 + $0xf0] sm:$0xff] %v2819_v5  ;;  %v2170_v3 = vadd.f32 %v2169_v31, %v2001_v28  ;;  %v2338_v55 = vpop.f32.mrf.mxu3  ;;  %v3995_v5 = vld [vmem:[%s4489_s29 + $0x414] sm:$0xf]  ;;  %v3584_v28 = vld [vmem:[%s4489_s29 + $0x424] sm:$0xf0] }
 0x248   : > { %v2003_v59 = vpop.f32.mrf.mxu1 }
 0x249   : > { %v2339_v0 = vadd.f32 %v2338_v55, %v2170_v3  ;;  %v2004_v43 = vadd.f32 %v2003_v59, %v4575_v22  ;;  %v3592_v3 = vld [vmem:[%s4489_s29 + $0x42c] sm:$0xf0]  ;;  %v3598_v55 = vld [vmem:[%s4489_s29 + $0x420] sm:$0xf] }
 0x24a   : > { %v2510_v45 = vpop.f32.mrf.mxu0 }
 0x24b   : > { %v2508_v30 = vadd.f32 %v2507_v11, %v2339_v0  ;;  %2042 = vmatmul.bf16.gmra.mxu1 %v3547_v32  ;;  %2211 = vmatmul.bf16.gmra.mxu2 %v3551_v38  ;;  %v3999_v32 = vld [vmem:[%s4489_s29 + $0x430] sm:$0xf0]  ;;  %v3591_v0 = vor.u32 %v3998_v60, %v3590_v49  ;;  %v3624_v49 = vld [vmem:[%s4489_s29 + $0x474] sm:$0xf0]  ;;  %v3630_v60 = vld [vmem:[%s4489_s29 + $0x468] sm:$0xf] }
 0x24c   : > { %2380 = vmatmul.bf16.gmra.mxu3 %v3555_v37 }
 0x24d   : > { %2549 = vmatmul.bf16.gmra.mxu0 %v3559_v48  ;;  %v2820_v47 = vadd.f32 %v4970_v20, %v2508_v30  ;;  %v3587_v48 = vor.u32 %v3995_v5, %v3584_v28  ;;  %v3595_v30 = vor.u32 %v3996_v63, %v3592_v3  ;;  %v4005_v28 = vld [vmem:[%s4489_s29 + $0x464] sm:$0xf]  ;;  %v4008_v63 = vld [vmem:[%s4489_s29 + $0x478] sm:$0xf0]  ;;  %v3632_v3 = vld [vmem:[%s4489_s29 + $0x47c] sm:$0xf0] }
 0x24e   : > { %v2172_v21 = vpop.f32.mrf.mxu2 }
 0x24f   : > { %2884 = vst [vmem:[%s4777_s22 + $0xf8] sm:$0xff] %v2820_v47  ;;  %v2173_v33 = vadd.f32 %v2172_v21, %v2004_v43  ;;  %v2341_v1 = vpop.f32.mrf.mxu3  ;;  %v3599_v47 = vor.u32 %v3999_v32, %v3598_v55  ;;  %v3638_v55 = vld [vmem:[%s4489_s29 + $0x470] sm:$0xf]  ;;  %v4009_v32 = vld [vmem:[%s4489_s29 + $0x480] sm:$0xf0] }
 0x250   : > { %v2005_v16 = vpop.f32.mrf.mxu1 }
 0x251   : > { %v2342_v18 = vadd.f32 %v2341_v1, %v2173_v33  ;;  %v2006_v22 = vadd.f32 %v2005_v16, %v4591_v34 }
 0x252   : > { %v2512_v6 = vpop.f32.mrf.mxu0 }
 0x253   : > { %v2511_v57 = vadd.f32 %v2510_v45, %v2342_v18 }
 0x255   : > { %v2821_v23 = vadd.f32 %v4970_v20, %v2511_v57 }
 0x256   : > { %v2174_v40 = vpop.f32.mrf.mxu2 }
 0x257   : > { %2885 = vst [vmem:[%s4777_s22 + $0x100] sm:$0xff] %v2821_v23  ;;  %v2175_v41 = vadd.f32 %v2174_v40, %v2006_v22  ;;  %v2343_v4 = vpop.f32.mrf.mxu3  ;;  %v3610_v23 = vld [vmem:[%s4489_s29 + $0x440] sm:$0xf]  ;;  %v4003_v22 = vld [vmem:[%s4489_s29 + $0x450] sm:$0xf0] }
 0x258   : > { %v2008_v36 = vpop.f32.mrf.mxu1  ;;  %v3618_v40 = vld [vmem:[%s4489_s29 + $0x448] sm:$0xf] }
 0x259   : > { %v2344_v24 = vadd.f32 %v2343_v4, %v2175_v41  ;;  %v2009_v15 = vadd.f32 %v2008_v36, %v4599_v42  ;;  %v4004_v41 = vld [vmem:[%s4489_s29 + $0x458] sm:$0xf0]  ;;  %v3607_v36 = vor.u32 %v4000_v44, %v3604_v56  ;;  %v3644_v44 = vld [vmem:[%s4489_s29 + $0x49c] sm:$0xf0]  ;;  %v3650_v56 = vld [vmem:[%s4489_s29 + $0x490] sm:$0xf] }
 0x25a   : > { %v2515_v61 = vpop.f32.mrf.mxu0 }
 0x25b   : > { %v2513_v35 = vadd.f32 %v2512_v6, %v2344_v24  ;;  %2047 = vmatmul.bf16.gmra.mxu1 %v3567_v12  ;;  %2216 = vmatmul.bf16.gmra.mxu2 %v3571_v53  ;;  %v3615_v24 = vor.u32 %v4001_v14, %v3612_v7  ;;  %v4014_v7 = vld [vmem:[%s4489_s29 + $0x4a8] sm:$0xf0] }
 0x25c   : > { %2385 = vmatmul.bf16.gmra.mxu3 %v3575_v50  ;;  %v3611_v50 = vor.u32 %v4003_v22, %v3610_v23  ;;  %v4013_v23 = vld [vmem:[%s4489_s29 + $0x4a0] sm:$0xf0]  ;;  %v4011_v22 = vld [vmem:[%s4489_s29 + $0x494] sm:$0xf] }
 0x25d   : > { %2554 = vmatmul.bf16.gmra.mxu0 %v3579_v13  ;;  %v2822_v34 = vadd.f32 %v4970_v20, %v2513_v35 }
 0x25e   : > { %v2177_v11 = vpop.f32.mrf.mxu2 }
 0x25f   : > { %2886 = vst [vmem:[%s4777_s22 + $0x108] sm:$0xff] %v2822_v34  ;;  %v2178_v58 = vadd.f32 %v2177_v11, %v2009_v15  ;;  %v2346_v26 = vpop.f32.mrf.mxu3 }
 0x260   : > { %v2010_v29 = vpop.f32.mrf.mxu1 }
 0x261   : > { %v2347_v17 = vadd.f32 %v2346_v26, %v2178_v58  ;;  %v2011_v42 = vadd.f32 %v2010_v29, %v4615_v54 }
 0x262   : > { %v2517_v51 = vpop.f32.mrf.mxu0 }
 0x263   : > { %v2516_v25 = vadd.f32 %v2515_v61, %v2347_v17  ;;  %v3619_v61 = vor.u32 %v4004_v41, %v3618_v40 }
 0x265   : > { %v2823_v31 = vadd.f32 %v4970_v20, %v2516_v25 }
 0x266   : > { %v2179_v38 = vpop.f32.mrf.mxu2 }
 0x267   : > { %2887 = vst [vmem:[%s4777_s22 + $0x110] sm:$0xff] %v2823_v31  ;;  %v2180_v59 = vadd.f32 %v2179_v38, %v2011_v42  ;;  %v2348_v37 = vpop.f32.mrf.mxu3  ;;  %v4006_v31 = vld [vmem:[%s4489_s29 + $0x46c] sm:$0xf] }
 0x268   : > { %v2013_v45 = vpop.f32.mrf.mxu1 }
 0x269   : > { %v2349_v43 = vadd.f32 %v2348_v37, %v2180_v59  ;;  %v2014_v1 = vadd.f32 %v2013_v45, %v4623_v62 }
 0x26a   : > { %v2520_v21 = vpop.f32.mrf.mxu0 }
 0x26b   : > { %v2518_v33 = vadd.f32 %v2517_v51, %v2349_v43  ;;  %2052 = vmatmul.bf16.gmra.mxu1 %v3587_v48  ;;  %2221 = vmatmul.bf16.gmra.mxu2 %v3591_v0  ;;  %v3627_v48 = vor.u32 %v4005_v28, %v3624_v49  ;;  %v3631_v0 = vor.u32 %v4008_v63, %v3630_v60  ;;  %v3670_v28 = vld [vmem:[%s4489_s29 + $0x4b8] sm:$0xf]  ;;  %v4018_v49 = vld [vmem:[%s4489_s29 + $0x4c8] sm:$0xf0]  ;;  %v4016_v60 = vld [vmem:[%s4489_s29 + $0x4bc] sm:$0xf] }
 0x26c   : > { %2390 = vmatmul.bf16.gmra.mxu3 %v3595_v30  ;;  %v3635_v30 = vor.u32 %v4006_v31, %v3632_v3  ;;  %v5217_v31 = vld [vmem:[#allocation25_spill] sm:$0xff] }
 0x26d   : > { %2559 = vmatmul.bf16.gmra.mxu0 %v3599_v47  ;;  %v2824_v54 = vadd.f32 %v4970_v20, %v2518_v33  ;;  %v3639_v47 = vor.u32 %v4009_v32, %v3638_v55  ;;  %v3678_v3 = vld [vmem:[%s4489_s29 + $0x4c0] sm:$0xf]  ;;  %v4019_v55 = vld [vmem:[%s4489_s29 + $0x4d0] sm:$0xf0] }
 0x26e   : > { %v2182_v16 = vpop.f32.mrf.mxu2 }
 0x26f   : > { %2888 = vst [vmem:[%s4777_s22 + $0x118] sm:$0xff] %v2824_v54  ;;  %v2183_v18 = vadd.f32 %v2182_v16, %v2014_v1  ;;  %v2351_v6 = vpop.f32.mrf.mxu3 }
 0x270   : > { %v2015_v57 = vpop.f32.mrf.mxu1 }
 0x271   : > { %v2352_v27 = vadd.f32 %v2351_v6, %v2183_v18  ;;  %v2016_v62 = vadd.f32 %v2015_v57, %v4639_v10 }
 0x272   : > { %v2522_v9 = vpop.f32.mrf.mxu0 }
 0x273   : > { %v2521_v46 = vadd.f32 %v2520_v21, %v2352_v27 }
 0x275   : > { %v2825_v2 = vadd.f32 %v4970_v20, %v2521_v46  ;;  %v4010_v46 = vld [vmem:[%s4489_s29 + $0x48c] sm:$0xf] }
 0x276   : > { %v2184_v4 = vpop.f32.mrf.mxu2 }
 0x277   : > { %2889 = vst [vmem:[%s4777_s22 + $0x120] sm:$0xff] %v2825_v2  ;;  %v2185_v12 = vadd.f32 %v2184_v4, %v2016_v62  ;;  %v2353_v53 = vpop.f32.mrf.mxu3  ;;  %v3652_v2 = vld [vmem:[%s4489_s29 + $0x4a4] sm:$0xf0]  ;;  %v3658_v62 = vld [vmem:[%s4489_s29 + $0x498] sm:$0xf] }
 0x278   : > { %v2018_v13 = vpop.f32.mrf.mxu1 }
 0x279   : > { %v2354_v35 = vadd.f32 %v2353_v53, %v2185_v12  ;;  %v2019_v11 = vadd.f32 %v2018_v13, %v4647_v19  ;;  %v3647_v12 = vor.u32 %v4010_v46, %v3644_v44  ;;  %v3651_v53 = vor.u32 %v4013_v23, %v3650_v56  ;;  %v4020_v46 = vld [vmem:[%s4489_s29 + $0x4dc] sm:$0xf]  ;;  %v3684_v44 = vld [vmem:[%s4489_s29 + $0x4ec] sm:$0xf0]  ;;  %v3690_v56 = vld [vmem:[%s4489_s29 + $0x4e0] sm:$0xf] }
 0x27a   : > { %v2525_v34 = vpop.f32.mrf.mxu0  ;;  %v3659_v13 = vor.u32 %v4014_v7, %v3658_v62  ;;  %v4023_v23 = vld [vmem:[%s4489_s29 + $0x4f0] sm:$0xf0]  ;;  %v3692_v62 = vld [vmem:[%s4489_s29 + $0x4f4] sm:$0xf0]  ;;  %v3698_v7 = vld [vmem:[%s4489_s29 + $0x4e8] sm:$0xf] }
 0x27b   : > { %v2523_v15 = vadd.f32 %v2522_v9, %v2354_v35  ;;  %2057 = vmatmul.bf16.gmra.mxu1 %v3607_v36  ;;  %2226 = vmatmul.bf16.gmra.mxu2 %v3611_v50  ;;  %v3655_v50 = vor.u32 %v4011_v22, %v3652_v2  ;;  %v4021_v22 = vld [vmem:[%s4489_s29 + $0x4e4] sm:$0xf] }
 0x27c   : > { %2395 = vmatmul.bf16.gmra.mxu3 %v3615_v24 }
 0x27d   : > { %2564 = vmatmul.bf16.gmra.mxu0 %v3619_v61  ;;  %v2826_v10 = vadd.f32 %v4970_v20, %v2523_v15 }
 0x27e   : > { %v2187_v58 = vpop.f32.mrf.mxu2 }
 0x27f   : > { %2890 = vst [vmem:[%s4777_s22 + $0x128] sm:$0xff] %v2826_v10  ;;  %v2188_v26 = vadd.f32 %v2187_v58, %v2019_v11  ;;  %v2356_v29 = vpop.f32.mrf.mxu3 }
 0x280   : > { %v2020_v17 = vpop.f32.mrf.mxu1 }
 0x281   : > { %v2357_v51 = vadd.f32 %v2356_v29, %v2188_v26  ;;  %v2021_v19 = vadd.f32 %v2020_v17, %v4663_v39 }
 0x282   : > { %v2527_v25 = vpop.f32.mrf.mxu0 }
 0x283   : > { %v2526_v5 = vadd.f32 %v2525_v34, %v2357_v51  ;;  %v5216_v34 = vld [vmem:[#allocation23_spill] sm:$0xff] }
 0x285   : > { %v2827_v42 = vadd.f32 %v4970_v20, %v2526_v5  ;;  %v3664_v5 = vld [vmem:[%s4489_s29 + $0x4c4] sm:$0xf0] }
 0x286   : > { %v2189_v38 = vpop.f32.mrf.mxu2 }
 0x287   : > { %2891 = vst [vmem:[%s4777_s22 + $0x130] sm:$0xff] %v2827_v42  ;;  %v2190_v59 = vadd.f32 %v2189_v38, %v2021_v19  ;;  %v2358_v37 = vpop.f32.mrf.mxu3  ;;  %v3672_v19 = vld [vmem:[%s4489_s29 + $0x4cc] sm:$0xf0] }
 0x288   : > { %v2023_v45 = vpop.f32.mrf.mxu1 }
 0x289   : > { %v2359_v43 = vadd.f32 %v2358_v37, %v2190_v59  ;;  %v2024_v54 = vadd.f32 %v2023_v45, %v4671_v52  ;;  %v3675_v45 = vor.u32 %v4016_v60, %v3672_v19 }
 0x28a   : > { %v2530_v21 = vpop.f32.mrf.mxu0 }
 0x28b   : > { %v2528_v33 = vadd.f32 %v2527_v25, %v2359_v43  ;;  %2062 = vmatmul.bf16.gmra.mxu1 %v3627_v48  ;;  %2231 = vmatmul.bf16.gmra.mxu2 %v3631_v0  ;;  %v4015_v25 = vld [vmem:[%s4489_s29 + $0x4b4] sm:$0xf]  ;;  %v3671_v48 = vor.u32 %v4018_v49, %v3670_v28  ;;  %v5221_v28 = vld [vmem:[#allocation33_spill] sm:$0xff] }
 0x28c   : > { %2400 = vmatmul.bf16.gmra.mxu3 %v3635_v30  ;;  %v3667_v37 = vor.u32 %v4015_v25, %v3664_v5  ;;  %v3679_v30 = vor.u32 %v4019_v55, %v3678_v3 }
 0x28d   : > { %2569 = vmatmul.bf16.gmra.mxu0 %v3639_v47  ;;  %v2828_v39 = vadd.f32 %v4970_v20, %v2528_v33 }
 0x28e   : > { %v2192_v1 = vpop.f32.mrf.mxu2 }
 0x28f   : > { %2892 = vst [vmem:[%s4777_s22 + $0x138] sm:$0xff] %v2828_v39  ;;  %v2193_v16 = vadd.f32 %v2192_v1, %v2024_v54  ;;  %v2361_v18 = vpop.f32.mrf.mxu3  ;;  %v5218_v39 = vld [vmem:[#allocation27_spill] sm:$0xff] }
 0x290   : > { %v2025_v6 = vpop.f32.mrf.mxu1 }
 0x291   : > { %v2362_v57 = vadd.f32 %v2361_v18, %v2193_v16  ;;  %v2026_v52 = vadd.f32 %v2025_v6, %v4687_v8 }
 0x292   : > { %v2532_v27 = vpop.f32.mrf.mxu0 }
 0x293   : > { %v2531_v9 = vadd.f32 %v2530_v21, %v2362_v57 }
 0x295   : > { %v2829_v14 = vadd.f32 %v4970_v20, %v2531_v9 }
 0x296   : > { %v2194_v40 = vpop.f32.mrf.mxu2 }
 0x297   : > { %2893 = vst [vmem:[%s4777_s22 + $0x140] sm:$0xff] %v2829_v14  ;;  %v2195_v41 = vadd.f32 %v2194_v40, %v2026_v52  ;;  %v2363_v4 = vpop.f32.mrf.mxu3  ;;  %v5219_v52 = vld [vmem:[#allocation29_spill] sm:$0xff]  ;;  %v4024_v40 = vld [vmem:[%s4489_s29 + $0x4f8] sm:$0xf0] }
 0x298   : > { %v2028_v36 = vpop.f32.mrf.mxu1 }
 0x299   : > { %v2364_v24 = vadd.f32 %v2363_v4, %v2195_v41  ;;  %v2029_v15 = vadd.f32 %v2028_v36, %v5216_v34  ;;  %v3691_v36 = vor.u32 %v4023_v23, %v3690_v56 }
 0x29a   : > { %v2535_v61 = vpop.f32.mrf.mxu0 }
 0x29b   : > { %v2533_v35 = vadd.f32 %v2532_v27, %v2364_v24  ;;  %2067 = vmatmul.bf16.gmra.mxu1 %v3647_v12  ;;  %2236 = vmatmul.bf16.gmra.mxu2 %v3651_v53  ;;  %v3687_v53 = vor.u32 %v4020_v46, %v3684_v44  ;;  %v3699_v24 = vor.u32 %v4024_v40, %v3698_v7  ;;  %v5224_v46 = vld [vmem:[#allocation15_spill] sm:$0xff]  ;;  %v5225_v40 = vld [vmem:[#allocation16_spill] sm:$0xff] }
 0x29c   : > { %2405 = vmatmul.bf16.gmra.mxu3 %v3655_v50 }
 0x29d   : > { %2574 = vmatmul.bf16.gmra.mxu0 %v3659_v13  ;;  %v2830_v8 = vadd.f32 %v4970_v20, %v2533_v35  ;;  %v3695_v13 = vor.u32 %v4021_v22, %v3692_v62 }
 0x29e   : > { %v2197_v10 = vpop.f32.mrf.mxu2 }
 0x29f   : > { %2894 = vst [vmem:[%s4777_s22 + $0x148] sm:$0xff] %v2830_v8  ;;  %v2198_v11 = vadd.f32 %v2197_v10, %v2029_v15  ;;  %v2366_v58 = vpop.f32.mrf.mxu3  ;;  %v5220_v15 = vld [vmem:[#allocation31_spill] sm:$0xff] }
 0x2a0   : > { %v2030_v26 = vpop.f32.mrf.mxu1 }
 0x2a1   : > { %v2367_v29 = vadd.f32 %v2366_v58, %v2198_v11  ;;  %v2031_v42 = vadd.f32 %v2030_v26, %v5217_v31 }
 0x2a2   : > { %v2537_v17 = vpop.f32.mrf.mxu0 }
 0x2a3   : > { %v2536_v51 = vadd.f32 %v2535_v61, %v2367_v29 }
 0x2a5   : > { %v2831_v63 = vadd.f32 %v4970_v20, %v2536_v51 }
 0x2a6   : > { %v2199_v32 = vpop.f32.mrf.mxu2 }
 0x2a7   : > { %2895 = vst [vmem:[%s4777_s22 + $0x150] sm:$0xff] %v2831_v63  ;;  %v2200_v38 = vadd.f32 %v2199_v32, %v2031_v42  ;;  %v2368_v59 = vpop.f32.mrf.mxu3 }
 0x2a8   : > { %v2033_v0 = vpop.f32.mrf.mxu1 }
 0x2a9   : > { %v2369_v47 = vadd.f32 %v2368_v59, %v2200_v38  ;;  %v2034_v54 = vadd.f32 %v2033_v0, %v5218_v39  ;;  %v5222_v38 = vld [vmem:[#allocation13_spill] sm:$0xff] }
 0x2aa   : > { %v2540_v43 = vpop.f32.mrf.mxu0 }
 0x2ab   : > { %v2538_v21 = vadd.f32 %v2537_v17, %v2369_v47  ;;  %2072 = vmatmul.bf16.gmra.mxu1 %v3667_v37  ;;  %2241 = vmatmul.bf16.gmra.mxu2 %v3671_v48 }
 0x2ac   : > { %2410 = vmatmul.bf16.gmra.mxu3 %v3675_v45 }
 0x2ad   : > { %2579 = vmatmul.bf16.gmra.mxu0 %v3679_v30  ;;  %v2832_v33 = vadd.f32 %v4970_v20, %v2538_v21 }
 0x2ae   : > { %v2202_v1 = vpop.f32.mrf.mxu2 }
 0x2af   : > { %2896 = vst [vmem:[%s4777_s22 + $0x158] sm:$0xff] %v2832_v33  ;;  %v2203_v16 = vadd.f32 %v2202_v1, %v2034_v54  ;;  %v2371_v18 = vpop.f32.mrf.mxu3  ;;  %v5223_v33 = vld [vmem:[#allocation14_spill] sm:$0xff] }
 0x2b0   : > { %v2035_v6 = vpop.f32.mrf.mxu1 }
 0x2b1   : > { %v2372_v57 = vadd.f32 %v2371_v18, %v2203_v16  ;;  %v2036_v2 = vadd.f32 %v2035_v6, %v5219_v52 }
 0x2b2   : > { %v2542_v27 = vpop.f32.mrf.mxu0 }
 0x2b3   : > { %v2541_v9 = vadd.f32 %v2540_v43, %v2372_v57 }
 0x2b5   : > { %v2833_v14 = vadd.f32 %v4970_v20, %v2541_v9 }
 0x2b6   : > { %v2204_v41 = vpop.f32.mrf.mxu2 }
 0x2b7   : > { %2897 = vst [vmem:[%s4777_s22 + $0x160] sm:$0xff] %v2833_v14  ;;  %v2205_v4 = vadd.f32 %v2204_v41, %v2036_v2  ;;  %v2373_v12 = vpop.f32.mrf.mxu3 }
 0x2b8   : > { %v2038_v50 = vpop.f32.mrf.mxu1 }
 0x2b9   : > { %v2374_v61 = vadd.f32 %v2373_v12, %v2205_v4  ;;  %v2039_v10 = vadd.f32 %v2038_v50, %v5220_v15 }
 0x2ba   : > { %v2545_v35 = vpop.f32.mrf.mxu0 }
 0x2bb   : > { %v2543_v8 = vadd.f32 %v2542_v27, %v2374_v61  ;;  %2077 = vmatmul.bf16.gmra.mxu1 %v3687_v53  ;;  %2246 = vmatmul.bf16.gmra.mxu2 %v3691_v36 }
 0x2bc   : > { %2415 = vmatmul.bf16.gmra.mxu3 %v3695_v13 }
 0x2bd   : > { %2584 = vmatmul.bf16.gmra.mxu0 %v3699_v24  ;;  %v2834_v34 = vadd.f32 %v4970_v20, %v2543_v8 }
 0x2be   : > { %v2207_v11 = vpop.f32.mrf.mxu2 }
 0x2bf   : > { %2898 = vst [vmem:[%s4777_s22 + $0x168] sm:$0xff] %v2834_v34  ;;  %v2208_v58 = vadd.f32 %v2207_v11, %v2039_v10  ;;  %v2376_v26 = vpop.f32.mrf.mxu3 }
 0x2c0   : > { %v2040_v29 = vpop.f32.mrf.mxu1 }
 0x2c1   : > { %v2377_v17 = vadd.f32 %v2376_v26, %v2208_v58  ;;  %v2041_v49 = vadd.f32 %v2040_v29, %v5221_v28 }
 0x2c2   : > { %v2547_v51 = vpop.f32.mrf.mxu0 }
 0x2c3   : > { %v2546_v25 = vadd.f32 %v2545_v35, %v2377_v17  ;;  %v5226_v35 = vld [vmem:[#allocation17_spill] sm:$0xff] }
 0x2c5   : > { %v2835_v5 = vadd.f32 %v4970_v20, %v2546_v25 }
 0x2c6   : > { %v2209_v60 = vpop.f32.mrf.mxu2 }
 0x2c7   : > { %2899 = vst [vmem:[%s4777_s22 + $0x170] sm:$0xff] %v2835_v5  ;;  %v2210_v63 = vadd.f32 %v2209_v60, %v2041_v49  ;;  %v2378_v31 = vpop.f32.mrf.mxu3 }
 0x2c8   : > { %v2043_v42 = vpop.f32.mrf.mxu1 }
 0x2c9   : > { %v2379_v19 = vadd.f32 %v2378_v31, %v2210_v63  ;;  %v2044_v59 = vadd.f32 %v2043_v42, %v5222_v38 }
 0x2ca   : > { %v2550_v3 = vpop.f32.mrf.mxu0 }
 0x2cb   : > { %v2548_v55 = vadd.f32 %v2547_v51, %v2379_v19  ;;  %v5227_v51 = vld [vmem:[#allocation18_spill] sm:$0xff] }
 0x2cd   : > { %v2836_v32 = vadd.f32 %v4970_v20, %v2548_v55 }
 0x2ce   : > { %v2212_v37 = vpop.f32.mrf.mxu2 }
 0x2cf   : > { %2900 = vst [vmem:[%s4777_s22 + $0x178] sm:$0xff] %v2836_v32  ;;  %v2213_v48 = vadd.f32 %v2212_v37, %v2044_v59  ;;  %v2381_v0 = vpop.f32.mrf.mxu3 }
 0x2d0   : > { %v2045_v45 = vpop.f32.mrf.mxu1 }
 0x2d1   : > { %v2382_v30 = vadd.f32 %v2381_v0, %v2213_v48  ;;  %v2046_v39 = vadd.f32 %v2045_v45, %v5223_v33 }
 0x2d2   : > { %v2552_v47 = vpop.f32.mrf.mxu0 }
 0x2d3   : > { %v2551_v43 = vadd.f32 %v2550_v3, %v2382_v30  ;;  %v5228_v3 = vld [vmem:[#allocation19_spill] sm:$0xff] }
 0x2d5   : > { %v2837_v21 = vadd.f32 %v4970_v20, %v2551_v43 }
 0x2d6   : > { %v2214_v54 = vpop.f32.mrf.mxu2 }
 0x2d7   : > { %2901 = vst [vmem:[%s4777_s22 + $0x180] sm:$0xff] %v2837_v21  ;;  %v2215_v1 = vadd.f32 %v2214_v54, %v2046_v39  ;;  %v2383_v16 = vpop.f32.mrf.mxu3 }
 0x2d8   : > { %v2048_v18 = vpop.f32.mrf.mxu1 }
 0x2d9   : > { %v2384_v6 = vadd.f32 %v2383_v16, %v2215_v1  ;;  %v2049_v44 = vadd.f32 %v2048_v18, %v5224_v46 }
 0x2da   : > { %v2555_v57 = vpop.f32.mrf.mxu0 }
 0x2db   : > { %v2553_v27 = vadd.f32 %v2552_v47, %v2384_v6  ;;  %v5229_v47 = vld [vmem:[#allocation20_spill] sm:$0xff] }
 0x2dd   : > { %v2838_v9 = vadd.f32 %v4970_v20, %v2553_v27 }
 0x2de   : > { %v2217_v56 = vpop.f32.mrf.mxu2 }
 0x2df   : > { %2902 = vst [vmem:[%s4777_s22 + $0x188] sm:$0xff] %v2838_v9  ;;  %v2218_v23 = vadd.f32 %v2217_v56, %v2049_v44  ;;  %v2386_v22 = vpop.f32.mrf.mxu3 }
 0x2e0   : > { %v2050_v14 = vpop.f32.mrf.mxu1 }
 0x2e1   : > { %v2387_v52 = vadd.f32 %v2386_v22, %v2218_v23  ;;  %v2051_v41 = vadd.f32 %v2050_v14, %v5225_v40 }
 0x2e2   : > { %v2557_v2 = vpop.f32.mrf.mxu0 }
 0x2e3   : > { %v2556_v62 = vadd.f32 %v2555_v57, %v2387_v52  ;;  %v5230_v57 = vld [vmem:[#allocation21_spill] sm:$0xff] }
 0x2e5   : > { %v2839_v7 = vadd.f32 %v4970_v20, %v2556_v62 }
 0x2e6   : > { %v2219_v4 = vpop.f32.mrf.mxu2 }
 0x2e7   : > { %2903 = vst [vmem:[%s4777_s22 + $0x190] sm:$0xff] %v2839_v7  ;;  %v2220_v12 = vadd.f32 %v2219_v4, %v2051_v41  ;;  %v2388_v53 = vpop.f32.mrf.mxu3 }
 0x2e8   : > { %v2053_v36 = vpop.f32.mrf.mxu1 }
 0x2e9   : > { %v2389_v50 = vadd.f32 %v2388_v53, %v2220_v12  ;;  %v2054_v8 = vadd.f32 %v2053_v36, %v5226_v35 }
 0x2ea   : > { %v2560_v13 = vpop.f32.mrf.mxu0 }
 0x2eb   : > { %v2558_v24 = vadd.f32 %v2557_v2, %v2389_v50  ;;  %v5231_v2 = vld [vmem:[#allocation22_spill] sm:$0xff] }
 0x2ed   : > { %v2840_v61 = vadd.f32 %v4970_v20, %v2558_v24 }
 0x2ee   : > { %v2222_v34 = vpop.f32.mrf.mxu2 }
 0x2ef   : > { %2904 = vst [vmem:[%s4777_s22 + $0x198] sm:$0xff] %v2840_v61  ;;  %v2223_v15 = vadd.f32 %v2222_v34, %v2054_v8  ;;  %v2391_v10 = vpop.f32.mrf.mxu3 }
 0x2f0   : > { %v2055_v11 = vpop.f32.mrf.mxu1 }
 0x2f1   : > { %v2392_v58 = vadd.f32 %v2391_v10, %v2223_v15  ;;  %v2056_v25 = vadd.f32 %v2055_v11, %v5227_v51 }
 0x2f2   : > { %v2562_v26 = vpop.f32.mrf.mxu0 }
 0x2f3   : > { %v2561_v29 = vadd.f32 %v2560_v13, %v2392_v58  ;;  %v5232_v13 = vld [vmem:[#allocation24_spill] sm:$0xff] }
 0x2f5   : > { %v2841_v17 = vadd.f32 %v4970_v20, %v2561_v29 }
 0x2f6   : > { %v2224_v5 = vpop.f32.mrf.mxu2 }
 0x2f7   : > { %2905 = vst [vmem:[%s4777_s22 + $0x1a0] sm:$0xff] %v2841_v17  ;;  %v2225_v28 = vadd.f32 %v2224_v5, %v2056_v25  ;;  %v2393_v49 = vpop.f32.mrf.mxu3 }
 0x2f8   : > { %v2058_v60 = vpop.f32.mrf.mxu1 }
 0x2f9   : > { %v2394_v63 = vadd.f32 %v2393_v49, %v2225_v28  ;;  %v2059_v55 = vadd.f32 %v2058_v60, %v5228_v3 }
 0x2fa   : > { %v2565_v31 = vpop.f32.mrf.mxu0 }
 0x2fb   : > { %v2563_v42 = vadd.f32 %v2562_v26, %v2394_v63  ;;  %v5233_v26 = vld [vmem:[#allocation26_spill] sm:$0xff] }
 0x2fd   : > { %v2842_v19 = vadd.f32 %v4970_v20, %v2563_v42 }
 0x2fe   : > { %v2227_v32 = vpop.f32.mrf.mxu2 }
 0x2ff   : > { %2906 = vst [vmem:[%s4777_s22 + $0x1a8] sm:$0xff] %v2842_v19  ;;  %v2228_v38 = vadd.f32 %v2227_v32, %v2059_v55  ;;  %v2396_v59 = vpop.f32.mrf.mxu3 }
 0x300   : > { %v2060_v37 = vpop.f32.mrf.mxu1 }
 0x301   : > { %v2397_v48 = vadd.f32 %v2396_v59, %v2228_v38  ;;  %v2061_v43 = vadd.f32 %v2060_v37, %v5229_v47 }
 0x302   : > { %v2567_v0 = vpop.f32.mrf.mxu0 }
 0x303   : > { %v2566_v45 = vadd.f32 %v2565_v31, %v2397_v48  ;;  %v5234_v31 = vld [vmem:[#allocation28_spill] sm:$0xff]  ;;  %v5235_v48 = vld [vmem:[#allocation30_spill] sm:$0xff] }
 0x305   : > { %v2843_v30 = vadd.f32 %v4970_v20, %v2566_v45 }
 0x306   : > { %v2229_v21 = vpop.f32.mrf.mxu2 }
 0x307   : > { %2907 = vst [vmem:[%s4777_s22 + $0x1b0] sm:$0xff] %v2843_v30  ;;  %v2230_v33 = vadd.f32 %v2229_v21, %v2061_v43  ;;  %v2398_v39 = vpop.f32.mrf.mxu3 }
 0x308   : > { %v2063_v54 = vpop.f32.mrf.mxu1 }
 0x309   : > { %v2399_v1 = vadd.f32 %v2398_v39, %v2230_v33  ;;  %v2064_v27 = vadd.f32 %v2063_v54, %v5230_v57 }
 0x30a   : > { %v2570_v16 = vpop.f32.mrf.mxu0 }
 0x30b   : > { %v2568_v18 = vadd.f32 %v2567_v0, %v2399_v1  ;;  %v5236_v1 = vld [vmem:[#allocation32_spill] sm:$0xff] }
 0x30d   : > { %v2844_v6 = vadd.f32 %v4970_v20, %v2568_v18 }
 0x30e   : > { %v2232_v9 = vpop.f32.mrf.mxu2 }
 0x30f   : > { %2908 = vst [vmem:[%s4777_s22 + $0x1b8] sm:$0xff] %v2844_v6  ;;  %v2233_v46 = vadd.f32 %v2232_v9, %v2064_v27  ;;  %v2401_v44 = vpop.f32.mrf.mxu3 }
 0x310   : > { %v2065_v56 = vpop.f32.mrf.mxu1 }
 0x311   : > { %v2402_v23 = vadd.f32 %v2401_v44, %v2233_v46  ;;  %v2066_v62 = vadd.f32 %v2065_v56, %v5231_v2 }
 0x312   : > { %v2572_v22 = vpop.f32.mrf.mxu0 }
 0x313   : > { %v2571_v14 = vadd.f32 %v2570_v16, %v2402_v23  ;;  %v5237_v23 = vld [vmem:[#allocation34_spill] sm:$0xff] }
 0x315   : > { %v2845_v52 = vadd.f32 %v4970_v20, %v2571_v14 }
 0x316   : > { %v2234_v7 = vpop.f32.mrf.mxu2 }
 0x317   : > { %2909 = vst [vmem:[%s4777_s22 + $0x1c0] sm:$0xff] %v2845_v52  ;;  %v2235_v40 = vadd.f32 %v2234_v7, %v2066_v62  ;;  %v2403_v41 = vpop.f32.mrf.mxu3 }
 0x318   : > { %v2068_v4 = vpop.f32.mrf.mxu1 }
 0x319   : > { %v2404_v12 = vadd.f32 %v2403_v41, %v2235_v40  ;;  %v2069_v24 = vadd.f32 %v2068_v4, %v5232_v13 }
 0x31a   : > { %v2575_v53 = vpop.f32.mrf.mxu0 }
 0x31b   : > { %v2573_v36 = vadd.f32 %v2572_v22, %v2404_v12 }
 0x31d   : > { %v2846_v50 = vadd.f32 %v4970_v20, %v2573_v36 }
 0x31e   : > { %v2237_v61 = vpop.f32.mrf.mxu2 }
 0x31f   : > { %2910 = vst [vmem:[%s4777_s22 + $0x1c8] sm:$0xff] %v2846_v50  ;;  %v2238_v35 = vadd.f32 %v2237_v61, %v2069_v24  ;;  %v2406_v8 = vpop.f32.mrf.mxu3 }
 0x320   : > { %v2070_v34 = vpop.f32.mrf.mxu1 }
 0x321   : > { %v2407_v15 = vadd.f32 %v2406_v8, %v2238_v35  ;;  %v2071_v29 = vadd.f32 %v2070_v34, %v5233_v26 }
 0x322   : > { %v2577_v10 = vpop.f32.mrf.mxu0 }
 0x323   : > { %v2576_v11 = vadd.f32 %v2575_v53, %v2407_v15 }
 0x325   : > { %v2847_v58 = vadd.f32 %v4970_v20, %v2576_v11 }
 0x326   : > { %v2239_v17 = vpop.f32.mrf.mxu2 }
 0x327   : > { %2911 = vst [vmem:[%s4777_s22 + $0x1d0] sm:$0xff] %v2847_v58  ;;  %v2240_v51 = vadd.f32 %v2239_v17, %v2071_v29  ;;  %v2408_v25 = vpop.f32.mrf.mxu3 }
 0x328   : > { %v2073_v5 = vpop.f32.mrf.mxu1 }
 0x329   : > { %v2409_v28 = vadd.f32 %v2408_v25, %v2240_v51  ;;  %v2074_v42 = vadd.f32 %v2073_v5, %v5234_v31 }
 0x32a   : > { %v2580_v60 = vpop.f32.mrf.mxu0 }
 0x32b   : > { %v2578_v49 = vadd.f32 %v2577_v10, %v2409_v28 }
 0x32d   : > { %v2848_v63 = vadd.f32 %v4970_v20, %v2578_v49 }
 0x32e   : > { %v2242_v19 = vpop.f32.mrf.mxu2 }
 0x32f   : > { %2912 = vst [vmem:[%s4777_s22 + $0x1d8] sm:$0xff] %v2848_v63  ;;  %v2243_v3 = vadd.f32 %v2242_v19, %v2074_v42  ;;  %v2411_v55 = vpop.f32.mrf.mxu3 }
 0x330   : > { %v2075_v32 = vpop.f32.mrf.mxu1 }
 0x331   : > { %v2412_v38 = vadd.f32 %v2411_v55, %v2243_v3  ;;  %v2076_v0 = vadd.f32 %v2075_v32, %v5235_v48 }
 0x332   : > { %v2582_v45 = vpop.f32.mrf.mxu0 }
 0x333   : > { %v2581_v59 = vadd.f32 %v2580_v60, %v2412_v38 }
 0x335   : > { %v2849_v37 = vadd.f32 %v4970_v20, %v2581_v59 }
 0x336   : > { %v2244_v30 = vpop.f32.mrf.mxu2 }
 0x337   : > { %2913 = vst [vmem:[%s4777_s22 + $0x1e0] sm:$0xff] %v2849_v37  ;;  %v2245_v47 = vadd.f32 %v2244_v30, %v2076_v0  ;;  %v2413_v43 = vpop.f32.mrf.mxu3 }
 0x338   : > { %v2078_v21 = vpop.f32.mrf.mxu1 }
 0x339   : > { %v2414_v33 = vadd.f32 %v2413_v43, %v2245_v47  ;;  %v2079_v16 = vadd.f32 %v2078_v21, %v5236_v1 }
 0x33a   : > { %v2585_v27 = vpop.f32.mrf.mxu0 }
 0x33b   : > { %v2583_v39 = vadd.f32 %v2582_v45, %v2414_v33 }
 0x33d   : > { %v2850_v54 = vadd.f32 %v4970_v20, %v2583_v39 }
 0x33e   : > { %v2247_v18 = vpop.f32.mrf.mxu2 }
 0x33f   : > { %2914 = vst [vmem:[%s4777_s22 + $0x1e8] sm:$0xff] %v2850_v54  ;;  %v2248_v6 = vadd.f32 %v2247_v18, %v2079_v16  ;;  %v2416_v57 = vpop.f32.mrf.mxu3 }
 0x340   : > { %v2080_v46 = vpop.f32.mrf.mxu1 }
 0x341   : > { %v2417_v9 = vadd.f32 %v2416_v57, %v2248_v6  ;;  %v2081_v22 = vadd.f32 %v2080_v46, %v5237_v23 }
 0x342   : > { %v2587_v7 = vpop.f32.mrf.mxu0 }
 0x343   : > { %v2586_v44 = vadd.f32 %v2585_v27, %v2417_v9 }
 0x345   : > { %v2851_v56 = vadd.f32 %v4970_v20, %v2586_v44 }
 0x346   : > { %v2249_v14 = vpop.f32.mrf.mxu2 }
 0x347   : > { %2915 = vst [vmem:[%s4777_s22 + $0x1f0] sm:$0xff] %v2851_v56  ;;  %v2250_v52 = vadd.f32 %v2249_v14, %v2081_v22  ;;  %v2418_v2 = vpop.f32.mrf.mxu3 }
 0x349   : > { %v2419_v62 = vadd.f32 %v2418_v2, %v2250_v52 }
 0x34b   : > { %v2588_v40 = vadd.f32 %v2587_v7, %v2419_v62 }
 0x34d   : > { %v2852_v41 = vadd.f32 %v4970_v20, %v2588_v40 }
 0x34f   : > { %2916 = vst [vmem:[%s4777_s22 + $0x1f8] sm:$0xff] %v2852_v41 }
 0x350   : > { %4301 = shalt.err (!%p4298_p12)
}
 0x351   : > { %s4368_s11 = smov 128   ;;  %s4369_s29 = smov 8  }
 0x352   : > { %4103 = dma.vmem_to_hbm [thread:$0]  (%p4468_p5), %s2932_s4, 8192, %s2934_s5, %s2918_s15, %s4368_s11, %s4368_s11, %s4369_s29  }
 0x353 PF: > { %p4125_p13 = scmp.ge.s32.totalorder %s4360_s17, 2  ;;  %s2948_s20 = sand.u32 1, %s4340_s12  }
 0x354   : > { %s2949_s22 = scalar_lea.sflag [#allocation5], %s2948_s20 }
 0x355   : > { %p4117_p0 = pnand %p4125_p13, %p4439_p6 }
 0x357   : > { %p4118_p3 = pneg %p4117_p0 }
 0x359   : > { %4335 = dma.done.wait (%p4118_p3), %s2949_s22, 8192  }
 0x35a   : > { %4337 = vsyncadd (%p4118_p3), %s2949_s22, 4294959104  ;;  %s20_s17 = sadd.s32 1, %s4360_s17   ;;  %s5238_s12 = smov %s4344_s13 }
 0x35b   : > { %p17_p7 = scmp.ge.s32.totalorder %s20_s17, 18   ;;  %s5239_s13 = smov %s4348_s14 }
 0x35c   : > { %s5240_s14 = smov %s4476_s26  ;;  %s5241_s15 = smov %s4356_s16 }
 0x35d   : > { %s5242_s16 = smov %s5244_s10  ;;  %19 = sbr.rel (!%p17_p7) target bundleno = 7 (0x7), region = 95 }
 0x362   :  { %2955 = vsyncpa [#allocation4], 1 }
 0x363   :  { %2957 = vsyncpa [#allocation4 + $0x1], 1 }
 0x364   :  { %2958 = vsyncpa [#allocation7], 1 }
 0x365   :  { %2959 = vsyncpa [#allocation5], 1 }
 0x366   :  { %2961 = vsyncpa [#allocation5 + $0x1], 1 }

</bundles_post_ra>
